<compile_context>
chip_gen: v5e
topology: v5e:2x2
jax: 0.10.0
libtpu: 0.0.40
codegen_flags: <defaults>
</compile_context>

<pallas_src>
import jax
import jax.numpy as jnp
from jax.experimental import pallas as pl
from jax.experimental.pallas import tpu as pltpu

# ---- model dimensions (small, consistent with the module) -------------------
V = 50          # vocab size
E = 32          # embed_size
D = 320         # regional embedding dim (r_fc / LSTM input size)
H = 10          # LSTM hidden / r_fc output size
R = 11          # number of regions (conv kernel height 11 => exactly 11 regions)
C = 4           # fc output classes
F = 30          # batch.feature dim
B = 2           # batch size
SRC_LEN = 32    # story length  -> 8 regions of 4 tokens
Q_LEN = 40      # question length, truncated to [:36] -> 3 regions of 12 tokens
S_REG = 8
Q_REG = 3
assert S_REG + Q_REG == R


# ---- Pallas kernel: everything after the embedding gather / mean-pool -------
def holistic_kernel(pq_ref, ps_ref, h0_ref, c0_ref, feat_ref,
                    wq_ref, bq_ref, ws_ref, bs_ref,
                    wxp_ref, bxp_ref, whh_ref,
                    wconv_ref, bconv_ref,
                    wfcr_ref, wfcf_ref, bfc_ref,
                    out_ref,
                    stk_ref, flat_ref):
    f32 = jnp.float32

    # Regional-CNN projections (E -> D), fused in-kernel so r_emb never hits HBM.
    r_q = jnp.dot(pq_ref[...], wq_ref[...], preferred_element_type=f32) + bq_ref[...]
    r_s = jnp.dot(ps_ref[...], ws_ref[...], preferred_element_type=f32) + bs_ref[...]

    # Hoisted D=320 contraction, fused r_fc + LSTM input projection:
    #   columns [0:H)  -> r_fc(r_emb)
    #   columns [H:5H) -> LSTM x-gates in (i, f, o, g) order (b_rfc/b_lstm folded in)
    xg_q = jnp.dot(r_q, wxp_ref[...], preferred_element_type=f32)
    xg_s = jnp.dot(r_s, wxp_ref[...], preferred_element_type=f32)
    xg = jnp.concatenate([xg_q, xg_s], axis=0) + bxp_ref[...]   # (R*B, 5H), region-major

    rfc = xg[:, :H]          # (R*B, H)   r_fc outputs, region-major
    xlstm = xg[:, H:]        # (R*B, 4H)  per-step LSTM input contributions (+biases)

    # Bottom half of the stacked scratch holds rfc (consumed by the fused conv gate).
    stk_ref[R * B:2 * R * B, :] = rfc

    # Batched LSTM(320 -> 10): per step the serial critical path is only a
    # (B, H) @ (H, 4H) matmul plus elementwise VPU/EUP work.
    whh = whh_ref[...]
    h = h0_ref[...]                                             # (B, H)
    c = c0_ref[...]                                             # (B, H)
    for t in range(R):
        gates = xlstm[t * B:(t + 1) * B, :] + jnp.dot(
            h, whh, preferred_element_type=f32)                 # (B, 4H)
        sig = jax.nn.sigmoid(gates[:, :3 * H])                  # i | f | o
        i_g = sig[:, 0 * H:1 * H]
        f_g = sig[:, 1 * H:2 * H]
        o_g = sig[:, 2 * H:3 * H]
        g_g = jnp.tanh(gates[:, 3 * H:])
        c = f_g * c + i_g * g_g
        h = o_g * jnp.tanh(c)
        stk_ref[t * B:(t + 1) * B, :] = h                       # r_out, region-major

    # Fused h_conv / r_conv gates, batched over B with kron(W, I_B)-expanded
    # weights: one (R*B, 2*R*B) @ (2*R*B, H) matmul, bias pre-summed/expanded.
    stk = stk_ref[...]                                          # (2*R*B, H)
    r_out = stk[:R * B, :]                                      # (R*B, H)
    gate = jax.nn.sigmoid(
        jnp.dot(wconv_ref[...], stk, preferred_element_type=f32) + bconv_ref[...])
    gated = gate * r_out                                        # (R*B, H)

    # dropout: inference-mode identity
    # Repack region-major (R*B, H) -> (B, R*H)  (torch .view(batch, -1) order).
    for r in range(R):
        flat_ref[:, r * H:(r + 1) * H] = gated[r * B:(r + 1) * B, :]

    # Final fc on cat([gated_flat, feature], 1): two matmuls, one (B, C) store.
    out_ref[...] = (
        jnp.dot(flat_ref[...], wfcr_ref[...], preferred_element_type=f32)
        + jnp.dot(feat_ref[...], wfcf_ref[...], preferred_element_type=f32)
        + bfc_ref[...])


# ---- host-side (traced, tiny) weight transforms ------------------------------
def _prep_kernel_weights(P):
    def permute_gates(w):  # torch gate order (i, f, g, o) -> (i, f, o, g)
        return jnp.concatenate(
            [w[..., 0:2 * H], w[..., 3 * H:4 * H], w[..., 2 * H:3 * H]], axis=-1)

    w_ih_p = permute_gates(P["W_ih"])            # (D, 4H)
    w_hh_p = permute_gates(P["W_hh"])            # (H, 4H)
    b_lstm_p = permute_gates(P["b_lstm"])        # (1, 4H)

    w_xproj = jnp.concatenate([P["W_rfc"], w_ih_p], axis=1)        # (D, 5H)
    b_xproj = jnp.concatenate([P["b_rfc"], b_lstm_p], axis=1)      # (1, 5H)

    eye_b = jnp.eye(B, dtype=jnp.float32)
    w_conv = jnp.concatenate([P["W_hconv"], P["W_rconv"]], axis=1)     # (R, 2R)
    w_conv_exp = jnp.kron(w_conv, eye_b)                               # (R*B, 2*R*B)
    b_conv_exp = jnp.repeat(P["b_hconv"] + P["b_rconv"], B, axis=0)    # (R*B, 1)

    w_fcr_flat = P["W_fc_r"].reshape(R * H, C)                         # (R*H, C)
    return w_xproj, b_xproj, w_hh_p, w_conv_exp, b_conv_exp, w_fcr_flat


def holistic_pallas(pq_rm, ps_rm, h0, c0, feature, P):
    (w_xproj, b_xproj, w_hh_p,
     w_conv_exp, b_conv_exp, w_fcr_flat) = _prep_kernel_weights(P)
    return pl.pallas_call(
        holistic_kernel,
        out_shape=jax.ShapeDtypeStruct((B, C), jnp.float32),
        # no grid: single invocation, batched over B; every input is a full-array
        # VMEM block (total footprint well under 1 MiB).
        scratch_shapes=[
            pltpu.VMEM((2 * R * B, H), jnp.float32),   # [r_out ; rfc] stacked, region-major
            pltpu.VMEM((B, R * H), jnp.float32),       # gated, flattened per batch
        ],
    )(pq_rm, ps_rm, h0, c0, feature,
      P["W_q"], P["b_q"].reshape(1, D), P["W_s"], P["b_s"].reshape(1, D),
      w_xproj, b_xproj, w_hh_p, w_conv_exp, b_conv_exp,
      w_fcr_flat, P["W_fc_f"], P["b_fc"])


# ---- glue: embedding gather + region mean-pool (plain JAX, jitted together) --
def compute_pooled(P, src_ids, q_ids):
    # src_ids: (SRC_LEN, B), q_ids: (Q_LEN, B)   (torch seq-first convention)
    s_embs = jnp.transpose(P["embed"][src_ids], (1, 0, 2))       # (B, SRC_LEN, E)
    q_embs = jnp.transpose(P["embed"][q_ids[:36]], (1, 0, 2))    # (B, 36, E)
    pooled_s = s_embs.reshape(B, S_REG, SRC_LEN // S_REG, E).mean(axis=2)  # (B, S_REG, E)
    pooled_q = q_embs.reshape(B, Q_REG, 36 // Q_REG, E).mean(axis=2)       # (B, Q_REG, E)
    # region-major rows (row = region * B + batch) so the recurrence reads
    # contiguous per-step slices inside the kernel.
    pq_rm = jnp.transpose(pooled_q, (1, 0, 2)).reshape(Q_REG * B, E)
    ps_rm = jnp.transpose(pooled_s, (1, 0, 2)).reshape(S_REG * B, E)
    return pq_rm, ps_rm


@jax.jit
def holistic_forward(P, src_ids, q_ids, feature, h0, c0):
    pq_rm, ps_rm = compute_pooled(P, src_ids, q_ids)
    return holistic_pallas(pq_rm, ps_rm, h0, c0, feature, P)


# ---- pure-JAX reference (sanity check) ---------------------------------------
def reference_forward(P, src_ids, q_ids, feature, h0, c0):
    s_embs = jnp.transpose(P["embed"][src_ids], (1, 0, 2))
    q_embs = jnp.transpose(P["embed"][q_ids[:36]], (1, 0, 2))

    def rcnn(x, n_reg, W, bias):                      # synthetic regional CNN
        b_, L, e_ = x.shape
        pooled = x.reshape(b_, n_reg, L // n_reg, e_).mean(axis=2)   # (B, n_reg, E)
        return pooled @ W + bias                                      # (B, n_reg, D)

    s_r = rcnn(s_embs, S_REG, P["W_s"], P["b_s"])
    q_r = rcnn(q_embs, Q_REG, P["W_q"], P["b_q"])
    r_emb = jnp.concatenate([q_r, s_r], axis=1)                       # (B, R, D)

    rfc = jnp.einsum("brd,dh->brh", r_emb, P["W_rfc"]) + P["b_rfc"]   # (B, R, H)

    h, c = h0, c0
    hs = []
    for t in range(R):
        gates = r_emb[:, t, :] @ P["W_ih"] + h @ P["W_hh"] + P["b_lstm"]
        i_g = jax.nn.sigmoid(gates[:, 0:H])
        f_g = jax.nn.sigmoid(gates[:, H:2 * H])
        g_g = jnp.tanh(gates[:, 2 * H:3 * H])
        o_g = jax.nn.sigmoid(gates[:, 3 * H:4 * H])
        c = f_g * c + i_g * g_g
        h = o_g * jnp.tanh(c)
        hs.append(h)
    r_out = jnp.stack(hs, axis=1)                                     # (B, R, H)

    gate_h = jnp.einsum("ok,bkj->boj", P["W_hconv"], r_out) + P["b_hconv"].reshape(1, R, 1)
    gate_r = jnp.einsum("ok,bkj->boj", P["W_rconv"], rfc) + P["b_rconv"].reshape(1, R, 1)
    gate = jax.nn.sigmoid(gate_h + gate_r)
    gated = gate * r_out                                              # (B, R, H)
    flat = gated.reshape(B, R * H)                                    # region-major flatten
    return flat @ P["W_fc_r"].reshape(R * H, C) + feature @ P["W_fc_f"] + P["b_fc"]


# ---- deterministic parameter init --------------------------------------------
def make_params(key):
    ks = jax.random.split(key, 16)
    n = lambda k, shape, s=0.1: (s * jax.random.normal(k, shape)).astype(jnp.float32)
    embed = n(ks[0], (V, E), 0.5).at[0].set(0.0)                      # padding_idx=0 row zeroed
    return dict(
        embed=embed,
        W_s=n(ks[1], (E, D)), b_s=n(ks[2], (D,)),
        W_q=n(ks[3], (E, D)), b_q=n(ks[4], (D,)),
        W_rfc=n(ks[5], (D, H)), b_rfc=n(ks[6], (1, H)),
        W_ih=n(ks[7], (D, 4 * H)), W_hh=n(ks[8], (H, 4 * H)), b_lstm=n(ks[9], (1, 4 * H)),
        W_hconv=n(ks[10], (R, R)), b_hconv=n(ks[11], (R, 1)),
        W_rconv=n(ks[12], (R, R)), b_rconv=n(ks[13], (R, 1)),
        W_fc_r=n(ks[14], (R, H, C)), W_fc_f=n(ks[15], (F, C)),
        b_fc=jnp.zeros((1, C), jnp.float32),
    )


if __name__ == "__main__":
    key = jax.random.PRNGKey(0)
    k_par, k_src, k_q, k_feat, k_h, k_c = jax.random.split(key, 6)

    P = make_params(k_par)
    src_ids = jax.random.randint(k_src, (SRC_LEN, B), 0, V)           # batch.src[0]
    q_ids = jax.random.randint(k_q, (Q_LEN, B), 0, V)                 # batch.question[0]
    feature = jax.random.normal(k_feat, (B, F), jnp.float32)          # batch.feature
    # LSTM initial states: weight.new(1, B, 10).normal_(0, 1)
    h0 = jax.random.normal(k_h, (B, H), jnp.float32)
    c0 = jax.random.normal(k_c, (B, H), jnp.float32)

    out = holistic_forward(P, src_ids, q_ids, feature, h0, c0)
    out = jax.block_until_ready(out)

    # high-precision reference (kernel f32 MXU matmuls run as multi-pass bf16)
    with jax.default_matmul_precision("highest"):
        ref = reference_forward(P, src_ids, q_ids, feature, h0, c0)
    err = float(jnp.max(jnp.abs(out - ref)))
    assert err < 2e-3, f"kernel/reference mismatch: {err}"

    print("KERNEL_OK")
</pallas_src>

<mosaic_0001>
module attributes {stable_mosaic.version = 11 : i64} {
  func.func @holistic_kernel(%arg0: memref<6x32xf32, #tpu.memory_space<vmem>>, %arg1: memref<16x32xf32, #tpu.memory_space<vmem>>, %arg2: memref<2x10xf32, #tpu.memory_space<vmem>>, %arg3: memref<2x10xf32, #tpu.memory_space<vmem>>, %arg4: memref<2x30xf32, #tpu.memory_space<vmem>>, %arg5: memref<32x320xf32, #tpu.memory_space<vmem>>, %arg6: memref<1x320xf32, #tpu.memory_space<vmem>>, %arg7: memref<32x320xf32, #tpu.memory_space<vmem>>, %arg8: memref<1x320xf32, #tpu.memory_space<vmem>>, %arg9: memref<320x50xf32, #tpu.memory_space<vmem>>, %arg10: memref<1x50xf32, #tpu.memory_space<vmem>>, %arg11: memref<10x40xf32, #tpu.memory_space<vmem>>, %arg12: memref<22x44xf32, #tpu.memory_space<vmem>>, %arg13: memref<22x1xf32, #tpu.memory_space<vmem>>, %arg14: memref<110x4xf32, #tpu.memory_space<vmem>>, %arg15: memref<30x4xf32, #tpu.memory_space<vmem>>, %arg16: memref<1x4xf32, #tpu.memory_space<vmem>>, %arg17: memref<2x4xf32, #tpu.memory_space<vmem>>, %arg18: memref<44x10xf32, #tpu.memory_space<vmem>>, %arg19: memref<2x110xf32, #tpu.memory_space<vmem>>) attributes {dimension_semantics = [], scalar_prefetch = 0 : i64, scratch_operands = 2 : i64, tpu.core_type = #tpu.core_type<tc>} {
    %c0 = arith.constant 0 : index
    %c0_0 = arith.constant 0 : index
    %0 = vector.load %arg0[%c0, %c0_0] : memref<6x32xf32, #tpu.memory_space<vmem>>, vector<6x32xf32>
    %c0_1 = arith.constant 0 : index
    %c0_2 = arith.constant 0 : index
    %1 = vector.load %arg5[%c0_1, %c0_2] : memref<32x320xf32, #tpu.memory_space<vmem>>, vector<32x320xf32>
    %cst = arith.constant dense<0.000000e+00> : vector<6x320xf32>
    %2 = tpu.matmul %0, %1, %cst {dimension_numbers = #tpu.dot_dimension_numbers<[1], [0], [0], [1], [0, 0, 1, 1], [], []>} : vector<6x32xf32>, vector<32x320xf32>, vector<6x320xf32> -> vector<6x320xf32>
    %c0_3 = arith.constant 0 : index
    %c0_4 = arith.constant 0 : index
    %3 = vector.load %arg6[%c0_3, %c0_4] : memref<1x320xf32, #tpu.memory_space<vmem>>, vector<1x320xf32>
    %4 = vector.broadcast %3 : vector<1x320xf32> to vector<6x320xf32>
    %5 = arith.addf %2, %4 : vector<6x320xf32>
    %c0_5 = arith.constant 0 : index
    %c0_6 = arith.constant 0 : index
    %6 = vector.load %arg1[%c0_5, %c0_6] : memref<16x32xf32, #tpu.memory_space<vmem>>, vector<16x32xf32>
    %c0_7 = arith.constant 0 : index
    %c0_8 = arith.constant 0 : index
    %7 = vector.load %arg7[%c0_7, %c0_8] : memref<32x320xf32, #tpu.memory_space<vmem>>, vector<32x320xf32>
    %cst_9 = arith.constant dense<0.000000e+00> : vector<16x320xf32>
    %8 = tpu.matmul %6, %7, %cst_9 {dimension_numbers = #tpu.dot_dimension_numbers<[1], [0], [0], [1], [0, 0, 1, 1], [], []>} : vector<16x32xf32>, vector<32x320xf32>, vector<16x320xf32> -> vector<16x320xf32>
    %c0_10 = arith.constant 0 : index
    %c0_11 = arith.constant 0 : index
    %9 = vector.load %arg8[%c0_10, %c0_11] : memref<1x320xf32, #tpu.memory_space<vmem>>, vector<1x320xf32>
    %10 = vector.broadcast %9 : vector<1x320xf32> to vector<16x320xf32>
    %11 = arith.addf %8, %10 : vector<16x320xf32>
    %c0_12 = arith.constant 0 : index
    %c0_13 = arith.constant 0 : index
    %12 = vector.load %arg9[%c0_12, %c0_13] : memref<320x50xf32, #tpu.memory_space<vmem>>, vector<320x50xf32>
    %cst_14 = arith.constant dense<0.000000e+00> : vector<6x50xf32>
    %13 = tpu.matmul %5, %12, %cst_14 {dimension_numbers = #tpu.dot_dimension_numbers<[1], [0], [0], [1], [0, 0, 1, 1], [], []>} : vector<6x320xf32>, vector<320x50xf32>, vector<6x50xf32> -> vector<6x50xf32>
    %c0_15 = arith.constant 0 : index
    %c0_16 = arith.constant 0 : index
    %14 = vector.load %arg9[%c0_15, %c0_16] : memref<320x50xf32, #tpu.memory_space<vmem>>, vector<320x50xf32>
    %cst_17 = arith.constant dense<0.000000e+00> : vector<16x50xf32>
    %15 = tpu.matmul %11, %14, %cst_17 {dimension_numbers = #tpu.dot_dimension_numbers<[1], [0], [0], [1], [0, 0, 1, 1], [], []>} : vector<16x320xf32>, vector<320x50xf32>, vector<16x50xf32> -> vector<16x50xf32>
    %16 = tpu.concatenate %13, %15 in 0 : vector<6x50xf32>, vector<16x50xf32> -> vector<22x50xf32>
    %c0_18 = arith.constant 0 : index
    %c0_19 = arith.constant 0 : index
    %17 = vector.load %arg10[%c0_18, %c0_19] : memref<1x50xf32, #tpu.memory_space<vmem>>, vector<1x50xf32>
    %18 = vector.broadcast %17 : vector<1x50xf32> to vector<22x50xf32>
    %19 = arith.addf %16, %18 : vector<22x50xf32>
    %20 = vector.extract_strided_slice %19 {offsets = [0, 0], sizes = [22, 10], strides = [1, 1]} : vector<22x50xf32> to vector<22x10xf32>
    %21 = vector.extract_strided_slice %19 {offsets = [0, 10], sizes = [22, 40], strides = [1, 1]} : vector<22x50xf32> to vector<22x40xf32>
    %c22 = arith.constant 22 : index
    %c0_20 = arith.constant 0 : index
    %22 = vector.load %arg18[%c22, %c0_20] : memref<44x10xf32, #tpu.memory_space<vmem>>, vector<22x10xf32>
    tpu.vector_store %arg18[%c22, %c0_20], %20 {strides = array<i32>} : memref<44x10xf32, #tpu.memory_space<vmem>>, vector<22x10xf32>,
    %c0_21 = arith.constant 0 : index
    %c0_22 = arith.constant 0 : index
    %23 = vector.load %arg11[%c0_21, %c0_22] : memref<10x40xf32, #tpu.memory_space<vmem>>, vector<10x40xf32>
    %c0_23 = arith.constant 0 : index
    %c0_24 = arith.constant 0 : index
    %24 = vector.load %arg2[%c0_23, %c0_24] : memref<2x10xf32, #tpu.memory_space<vmem>>, vector<2x10xf32>
    %c0_25 = arith.constant 0 : index
    %c0_26 = arith.constant 0 : index
    %25 = vector.load %arg3[%c0_25, %c0_26] : memref<2x10xf32, #tpu.memory_space<vmem>>, vector<2x10xf32>
    %26 = vector.extract_strided_slice %21 {offsets = [0, 0], sizes = [2, 40], strides = [1, 1]} : vector<22x40xf32> to vector<2x40xf32>
    %cst_27 = arith.constant dense<0.000000e+00> : vector<2x40xf32>
    %27 = tpu.matmul %24, %23, %cst_27 {dimension_numbers = #tpu.dot_dimension_numbers<[1], [0], [0], [1], [0, 0, 1, 1], [], []>} : vector<2x10xf32>, vector<10x40xf32>, vector<2x40xf32> -> vector<2x40xf32>
    %28 = arith.addf %26, %27 : vector<2x40xf32>
    %29 = vector.extract_strided_slice %28 {offsets = [0, 0], sizes = [2, 30], strides = [1, 1]} : vector<2x40xf32> to vector<2x30xf32>
    %30 = arith.negf %29 : vector<2x30xf32>
    %31 = math.exp %30 : vector<2x30xf32>
    %cst_28 = arith.constant 1.000000e+00 : f32
    %32 = vector.broadcast %cst_28 : f32 to vector<2x30xf32>
    %33 = arith.addf %32, %31 : vector<2x30xf32>
    %34 = arith.divf %32, %33 : vector<2x30xf32>
    %35 = vector.extract_strided_slice %34 {offsets = [0, 0], sizes = [2, 10], strides = [1, 1]} : vector<2x30xf32> to vector<2x10xf32>
    %36 = vector.extract_strided_slice %34 {offsets = [0, 10], sizes = [2, 10], strides = [1, 1]} : vector<2x30xf32> to vector<2x10xf32>
    %37 = vector.extract_strided_slice %34 {offsets = [0, 20], sizes = [2, 10], strides = [1, 1]} : vector<2x30xf32> to vector<2x10xf32>
    %38 = vector.extract_strided_slice %28 {offsets = [0, 30], sizes = [2, 10], strides = [1, 1]} : vector<2x40xf32> to vector<2x10xf32>
    %39 = math.tanh %38 : vector<2x10xf32>
    %40 = arith.mulf %36, %25 : vector<2x10xf32>
    %41 = arith.mulf %35, %39 : vector<2x10xf32>
    %42 = arith.addf %40, %41 : vector<2x10xf32>
    %43 = math.tanh %42 : vector<2x10xf32>
    %44 = arith.mulf %37, %43 : vector<2x10xf32>
    %c0_29 = arith.constant 0 : index
    %c0_30 = arith.constant 0 : index
    %45 = vector.load %arg18[%c0_29, %c0_30] : memref<44x10xf32, #tpu.memory_space<vmem>>, vector<2x10xf32>
    tpu.vector_store %arg18[%c0_29, %c0_30], %44 {strides = array<i32>} : memref<44x10xf32, #tpu.memory_space<vmem>>, vector<2x10xf32>,
    %46 = vector.extract_strided_slice %21 {offsets = [2, 0], sizes = [2, 40], strides = [1, 1]} : vector<22x40xf32> to vector<2x40xf32>
    %cst_31 = arith.constant dense<0.000000e+00> : vector<2x40xf32>
    %47 = tpu.matmul %44, %23, %cst_31 {dimension_numbers = #tpu.dot_dimension_numbers<[1], [0], [0], [1], [0, 0, 1, 1], [], []>} : vector<2x10xf32>, vector<10x40xf32>, vector<2x40xf32> -> vector<2x40xf32>
    %48 = arith.addf %46, %47 : vector<2x40xf32>
    %49 = vector.extract_strided_slice %48 {offsets = [0, 0], sizes = [2, 30], strides = [1, 1]} : vector<2x40xf32> to vector<2x30xf32>
    %50 = arith.negf %49 : vector<2x30xf32>
    %51 = math.exp %50 : vector<2x30xf32>
    %cst_32 = arith.constant 1.000000e+00 : f32
    %52 = vector.broadcast %cst_32 : f32 to vector<2x30xf32>
    %53 = arith.addf %52, %51 : vector<2x30xf32>
    %54 = arith.divf %52, %53 : vector<2x30xf32>
    %55 = vector.extract_strided_slice %54 {offsets = [0, 0], sizes = [2, 10], strides = [1, 1]} : vector<2x30xf32> to vector<2x10xf32>
    %56 = vector.extract_strided_slice %54 {offsets = [0, 10], sizes = [2, 10], strides = [1, 1]} : vector<2x30xf32> to vector<2x10xf32>
    %57 = vector.extract_strided_slice %54 {offsets = [0, 20], sizes = [2, 10], strides = [1, 1]} : vector<2x30xf32> to vector<2x10xf32>
    %58 = vector.extract_strided_slice %48 {offsets = [0, 30], sizes = [2, 10], strides = [1, 1]} : vector<2x40xf32> to vector<2x10xf32>
    %59 = math.tanh %58 : vector<2x10xf32>
    %60 = arith.mulf %56, %42 : vector<2x10xf32>
    %61 = arith.mulf %55, %59 : vector<2x10xf32>
    %62 = arith.addf %60, %61 : vector<2x10xf32>
    %63 = math.tanh %62 : vector<2x10xf32>
    %64 = arith.mulf %57, %63 : vector<2x10xf32>
    %c2 = arith.constant 2 : index
    %c0_33 = arith.constant 0 : index
    %65 = vector.load %arg18[%c2, %c0_33] : memref<44x10xf32, #tpu.memory_space<vmem>>, vector<2x10xf32>
    tpu.vector_store %arg18[%c2, %c0_33], %64 {strides = array<i32>} : memref<44x10xf32, #tpu.memory_space<vmem>>, vector<2x10xf32>,
    %66 = vector.extract_strided_slice %21 {offsets = [4, 0], sizes = [2, 40], strides = [1, 1]} : vector<22x40xf32> to vector<2x40xf32>
    %cst_34 = arith.constant dense<0.000000e+00> : vector<2x40xf32>
    %67 = tpu.matmul %64, %23, %cst_34 {dimension_numbers = #tpu.dot_dimension_numbers<[1], [0], [0], [1], [0, 0, 1, 1], [], []>} : vector<2x10xf32>, vector<10x40xf32>, vector<2x40xf32> -> vector<2x40xf32>
    %68 = arith.addf %66, %67 : vector<2x40xf32>
    %69 = vector.extract_strided_slice %68 {offsets = [0, 0], sizes = [2, 30], strides = [1, 1]} : vector<2x40xf32> to vector<2x30xf32>
    %70 = arith.negf %69 : vector<2x30xf32>
    %71 = math.exp %70 : vector<2x30xf32>
    %cst_35 = arith.constant 1.000000e+00 : f32
    %72 = vector.broadcast %cst_35 : f32 to vector<2x30xf32>
    %73 = arith.addf %72, %71 : vector<2x30xf32>
    %74 = arith.divf %72, %73 : vector<2x30xf32>
    %75 = vector.extract_strided_slice %74 {offsets = [0, 0], sizes = [2, 10], strides = [1, 1]} : vector<2x30xf32> to vector<2x10xf32>
    %76 = vector.extract_strided_slice %74 {offsets = [0, 10], sizes = [2, 10], strides = [1, 1]} : vector<2x30xf32> to vector<2x10xf32>
    %77 = vector.extract_strided_slice %74 {offsets = [0, 20], sizes = [2, 10], strides = [1, 1]} : vector<2x30xf32> to vector<2x10xf32>
    %78 = vector.extract_strided_slice %68 {offsets = [0, 30], sizes = [2, 10], strides = [1, 1]} : vector<2x40xf32> to vector<2x10xf32>
    %79 = math.tanh %78 : vector<2x10xf32>
    %80 = arith.mulf %76, %62 : vector<2x10xf32>
    %81 = arith.mulf %75, %79 : vector<2x10xf32>
    %82 = arith.addf %80, %81 : vector<2x10xf32>
    %83 = math.tanh %82 : vector<2x10xf32>
    %84 = arith.mulf %77, %83 : vector<2x10xf32>
    %c4 = arith.constant 4 : index
    %c0_36 = arith.constant 0 : index
    %85 = vector.load %arg18[%c4, %c0_36] : memref<44x10xf32, #tpu.memory_space<vmem>>, vector<2x10xf32>
    tpu.vector_store %arg18[%c4, %c0_36], %84 {strides = array<i32>} : memref<44x10xf32, #tpu.memory_space<vmem>>, vector<2x10xf32>,
    %86 = vector.extract_strided_slice %21 {offsets = [6, 0], sizes = [2, 40], strides = [1, 1]} : vector<22x40xf32> to vector<2x40xf32>
    %cst_37 = arith.constant dense<0.000000e+00> : vector<2x40xf32>
    %87 = tpu.matmul %84, %23, %cst_37 {dimension_numbers = #tpu.dot_dimension_numbers<[1], [0], [0], [1], [0, 0, 1, 1], [], []>} : vector<2x10xf32>, vector<10x40xf32>, vector<2x40xf32> -> vector<2x40xf32>
    %88 = arith.addf %86, %87 : vector<2x40xf32>
    %89 = vector.extract_strided_slice %88 {offsets = [0, 0], sizes = [2, 30], strides = [1, 1]} : vector<2x40xf32> to vector<2x30xf32>
    %90 = arith.negf %89 : vector<2x30xf32>
    %91 = math.exp %90 : vector<2x30xf32>
    %cst_38 = arith.constant 1.000000e+00 : f32
    %92 = vector.broadcast %cst_38 : f32 to vector<2x30xf32>
    %93 = arith.addf %92, %91 : vector<2x30xf32>
    %94 = arith.divf %92, %93 : vector<2x30xf32>
    %95 = vector.extract_strided_slice %94 {offsets = [0, 0], sizes = [2, 10], strides = [1, 1]} : vector<2x30xf32> to vector<2x10xf32>
    %96 = vector.extract_strided_slice %94 {offsets = [0, 10], sizes = [2, 10], strides = [1, 1]} : vector<2x30xf32> to vector<2x10xf32>
    %97 = vector.extract_strided_slice %94 {offsets = [0, 20], sizes = [2, 10], strides = [1, 1]} : vector<2x30xf32> to vector<2x10xf32>
    %98 = vector.extract_strided_slice %88 {offsets = [0, 30], sizes = [2, 10], strides = [1, 1]} : vector<2x40xf32> to vector<2x10xf32>
    %99 = math.tanh %98 : vector<2x10xf32>
    %100 = arith.mulf %96, %82 : vector<2x10xf32>
    %101 = arith.mulf %95, %99 : vector<2x10xf32>
    %102 = arith.addf %100, %101 : vector<2x10xf32>
    %103 = math.tanh %102 : vector<2x10xf32>
    %104 = arith.mulf %97, %103 : vector<2x10xf32>
    %c6 = arith.constant 6 : index
    %c0_39 = arith.constant 0 : index
    %105 = vector.load %arg18[%c6, %c0_39] : memref<44x10xf32, #tpu.memory_space<vmem>>, vector<2x10xf32>
    tpu.vector_store %arg18[%c6, %c0_39], %104 {strides = array<i32>} : memref<44x10xf32, #tpu.memory_space<vmem>>, vector<2x10xf32>,
    %106 = vector.extract_strided_slice %21 {offsets = [8, 0], sizes = [2, 40], strides = [1, 1]} : vector<22x40xf32> to vector<2x40xf32>
    %cst_40 = arith.constant dense<0.000000e+00> : vector<2x40xf32>
    %107 = tpu.matmul %104, %23, %cst_40 {dimension_numbers = #tpu.dot_dimension_numbers<[1], [0], [0], [1], [0, 0, 1, 1], [], []>} : vector<2x10xf32>, vector<10x40xf32>, vector<2x40xf32> -> vector<2x40xf32>
    %108 = arith.addf %106, %107 : vector<2x40xf32>
    %109 = vector.extract_strided_slice %108 {offsets = [0, 0], sizes = [2, 30], strides = [1, 1]} : vector<2x40xf32> to vector<2x30xf32>
    %110 = arith.negf %109 : vector<2x30xf32>
    %111 = math.exp %110 : vector<2x30xf32>
    %cst_41 = arith.constant 1.000000e+00 : f32
    %112 = vector.broadcast %cst_41 : f32 to vector<2x30xf32>
    %113 = arith.addf %112, %111 : vector<2x30xf32>
    %114 = arith.divf %112, %113 : vector<2x30xf32>
    %115 = vector.extract_strided_slice %114 {offsets = [0, 0], sizes = [2, 10], strides = [1, 1]} : vector<2x30xf32> to vector<2x10xf32>
    %116 = vector.extract_strided_slice %114 {offsets = [0, 10], sizes = [2, 10], strides = [1, 1]} : vector<2x30xf32> to vector<2x10xf32>
    %117 = vector.extract_strided_slice %114 {offsets = [0, 20], sizes = [2, 10], strides = [1, 1]} : vector<2x30xf32> to vector<2x10xf32>
    %118 = vector.extract_strided_slice %108 {offsets = [0, 30], sizes = [2, 10], strides = [1, 1]} : vector<2x40xf32> to vector<2x10xf32>
    %119 = math.tanh %118 : vector<2x10xf32>
    %120 = arith.mulf %116, %102 : vector<2x10xf32>
    %121 = arith.mulf %115, %119 : vector<2x10xf32>
    %122 = arith.addf %120, %121 : vector<2x10xf32>
    %123 = math.tanh %122 : vector<2x10xf32>
    %124 = arith.mulf %117, %123 : vector<2x10xf32>
    %c8 = arith.constant 8 : index
    %c0_42 = arith.constant 0 : index
    %125 = vector.load %arg18[%c8, %c0_42] : memref<44x10xf32, #tpu.memory_space<vmem>>, vector<2x10xf32>
    tpu.vector_store %arg18[%c8, %c0_42], %124 {strides = array<i32>} : memref<44x10xf32, #tpu.memory_space<vmem>>, vector<2x10xf32>,
    %126 = vector.extract_strided_slice %21 {offsets = [10, 0], sizes = [2, 40], strides = [1, 1]} : vector<22x40xf32> to vector<2x40xf32>
    %cst_43 = arith.constant dense<0.000000e+00> : vector<2x40xf32>
    %127 = tpu.matmul %124, %23, %cst_43 {dimension_numbers = #tpu.dot_dimension_numbers<[1], [0], [0], [1], [0, 0, 1, 1], [], []>} : vector<2x10xf32>, vector<10x40xf32>, vector<2x40xf32> -> vector<2x40xf32>
    %128 = arith.addf %126, %127 : vector<2x40xf32>
    %129 = vector.extract_strided_slice %128 {offsets = [0, 0], sizes = [2, 30], strides = [1, 1]} : vector<2x40xf32> to vector<2x30xf32>
    %130 = arith.negf %129 : vector<2x30xf32>
    %131 = math.exp %130 : vector<2x30xf32>
    %cst_44 = arith.constant 1.000000e+00 : f32
    %132 = vector.broadcast %cst_44 : f32 to vector<2x30xf32>
    %133 = arith.addf %132, %131 : vector<2x30xf32>
    %134 = arith.divf %132, %133 : vector<2x30xf32>
    %135 = vector.extract_strided_slice %134 {offsets = [0, 0], sizes = [2, 10], strides = [1, 1]} : vector<2x30xf32> to vector<2x10xf32>
    %136 = vector.extract_strided_slice %134 {offsets = [0, 10], sizes = [2, 10], strides = [1, 1]} : vector<2x30xf32> to vector<2x10xf32>
    %137 = vector.extract_strided_slice %134 {offsets = [0, 20], sizes = [2, 10], strides = [1, 1]} : vector<2x30xf32> to vector<2x10xf32>
    %138 = vector.extract_strided_slice %128 {offsets = [0, 30], sizes = [2, 10], strides = [1, 1]} : vector<2x40xf32> to vector<2x10xf32>
    %139 = math.tanh %138 : vector<2x10xf32>
    %140 = arith.mulf %136, %122 : vector<2x10xf32>
    %141 = arith.mulf %135, %139 : vector<2x10xf32>
    %142 = arith.addf %140, %141 : vector<2x10xf32>
    %143 = math.tanh %142 : vector<2x10xf32>
    %144 = arith.mulf %137, %143 : vector<2x10xf32>
    %c10 = arith.constant 10 : index
    %c0_45 = arith.constant 0 : index
    %145 = vector.load %arg18[%c10, %c0_45] : memref<44x10xf32, #tpu.memory_space<vmem>>, vector<2x10xf32>
    tpu.vector_store %arg18[%c10, %c0_45], %144 {strides = array<i32>} : memref<44x10xf32, #tpu.memory_space<vmem>>, vector<2x10xf32>,
    %146 = vector.extract_strided_slice %21 {offsets = [12, 0], sizes = [2, 40], strides = [1, 1]} : vector<22x40xf32> to vector<2x40xf32>
    %cst_46 = arith.constant dense<0.000000e+00> : vector<2x40xf32>
    %147 = tpu.matmul %144, %23, %cst_46 {dimension_numbers = #tpu.dot_dimension_numbers<[1], [0], [0], [1], [0, 0, 1, 1], [], []>} : vector<2x10xf32>, vector<10x40xf32>, vector<2x40xf32> -> vector<2x40xf32>
    %148 = arith.addf %146, %147 : vector<2x40xf32>
    %149 = vector.extract_strided_slice %148 {offsets = [0, 0], sizes = [2, 30], strides = [1, 1]} : vector<2x40xf32> to vector<2x30xf32>
    %150 = arith.negf %149 : vector<2x30xf32>
    %151 = math.exp %150 : vector<2x30xf32>
    %cst_47 = arith.constant 1.000000e+00 : f32
    %152 = vector.broadcast %cst_47 : f32 to vector<2x30xf32>
    %153 = arith.addf %152, %151 : vector<2x30xf32>
    %154 = arith.divf %152, %153 : vector<2x30xf32>
    %155 = vector.extract_strided_slice %154 {offsets = [0, 0], sizes = [2, 10], strides = [1, 1]} : vector<2x30xf32> to vector<2x10xf32>
    %156 = vector.extract_strided_slice %154 {offsets = [0, 10], sizes = [2, 10], strides = [1, 1]} : vector<2x30xf32> to vector<2x10xf32>
    %157 = vector.extract_strided_slice %154 {offsets = [0, 20], sizes = [2, 10], strides = [1, 1]} : vector<2x30xf32> to vector<2x10xf32>
    %158 = vector.extract_strided_slice %148 {offsets = [0, 30], sizes = [2, 10], strides = [1, 1]} : vector<2x40xf32> to vector<2x10xf32>
    %159 = math.tanh %158 : vector<2x10xf32>
    %160 = arith.mulf %156, %142 : vector<2x10xf32>
    %161 = arith.mulf %155, %159 : vector<2x10xf32>
    %162 = arith.addf %160, %161 : vector<2x10xf32>
    %163 = math.tanh %162 : vector<2x10xf32>
    %164 = arith.mulf %157, %163 : vector<2x10xf32>
    %c12 = arith.constant 12 : index
    %c0_48 = arith.constant 0 : index
    %165 = vector.load %arg18[%c12, %c0_48] : memref<44x10xf32, #tpu.memory_space<vmem>>, vector<2x10xf32>
    tpu.vector_store %arg18[%c12, %c0_48], %164 {strides = array<i32>} : memref<44x10xf32, #tpu.memory_space<vmem>>, vector<2x10xf32>,
    %166 = vector.extract_strided_slice %21 {offsets = [14, 0], sizes = [2, 40], strides = [1, 1]} : vector<22x40xf32> to vector<2x40xf32>
    %cst_49 = arith.constant dense<0.000000e+00> : vector<2x40xf32>
    %167 = tpu.matmul %164, %23, %cst_49 {dimension_numbers = #tpu.dot_dimension_numbers<[1], [0], [0], [1], [0, 0, 1, 1], [], []>} : vector<2x10xf32>, vector<10x40xf32>, vector<2x40xf32> -> vector<2x40xf32>
    %168 = arith.addf %166, %167 : vector<2x40xf32>
    %169 = vector.extract_strided_slice %168 {offsets = [0, 0], sizes = [2, 30], strides = [1, 1]} : vector<2x40xf32> to vector<2x30xf32>
    %170 = arith.negf %169 : vector<2x30xf32>
    %171 = math.exp %170 : vector<2x30xf32>
    %cst_50 = arith.constant 1.000000e+00 : f32
    %172 = vector.broadcast %cst_50 : f32 to vector<2x30xf32>
    %173 = arith.addf %172, %171 : vector<2x30xf32>
    %174 = arith.divf %172, %173 : vector<2x30xf32>
    %175 = vector.extract_strided_slice %174 {offsets = [0, 0], sizes = [2, 10], strides = [1, 1]} : vector<2x30xf32> to vector<2x10xf32>
    %176 = vector.extract_strided_slice %174 {offsets = [0, 10], sizes = [2, 10], strides = [1, 1]} : vector<2x30xf32> to vector<2x10xf32>
    %177 = vector.extract_strided_slice %174 {offsets = [0, 20], sizes = [2, 10], strides = [1, 1]} : vector<2x30xf32> to vector<2x10xf32>
    %178 = vector.extract_strided_slice %168 {offsets = [0, 30], sizes = [2, 10], strides = [1, 1]} : vector<2x40xf32> to vector<2x10xf32>
    %179 = math.tanh %178 : vector<2x10xf32>
    %180 = arith.mulf %176, %162 : vector<2x10xf32>
    %181 = arith.mulf %175, %179 : vector<2x10xf32>
    %182 = arith.addf %180, %181 : vector<2x10xf32>
    %183 = math.tanh %182 : vector<2x10xf32>
    %184 = arith.mulf %177, %183 : vector<2x10xf32>
    %c14 = arith.constant 14 : index
    %c0_51 = arith.constant 0 : index
    %185 = vector.load %arg18[%c14, %c0_51] : memref<44x10xf32, #tpu.memory_space<vmem>>, vector<2x10xf32>
    tpu.vector_store %arg18[%c14, %c0_51], %184 {strides = array<i32>} : memref<44x10xf32, #tpu.memory_space<vmem>>, vector<2x10xf32>,
    %186 = vector.extract_strided_slice %21 {offsets = [16, 0], sizes = [2, 40], strides = [1, 1]} : vector<22x40xf32> to vector<2x40xf32>
    %cst_52 = arith.constant dense<0.000000e+00> : vector<2x40xf32>
    %187 = tpu.matmul %184, %23, %cst_52 {dimension_numbers = #tpu.dot_dimension_numbers<[1], [0], [0], [1], [0, 0, 1, 1], [], []>} : vector<2x10xf32>, vector<10x40xf32>, vector<2x40xf32> -> vector<2x40xf32>
    %188 = arith.addf %186, %187 : vector<2x40xf32>
    %189 = vector.extract_strided_slice %188 {offsets = [0, 0], sizes = [2, 30], strides = [1, 1]} : vector<2x40xf32> to vector<2x30xf32>
    %190 = arith.negf %189 : vector<2x30xf32>
    %191 = math.exp %190 : vector<2x30xf32>
    %cst_53 = arith.constant 1.000000e+00 : f32
    %192 = vector.broadcast %cst_53 : f32 to vector<2x30xf32>
    %193 = arith.addf %192, %191 : vector<2x30xf32>
    %194 = arith.divf %192, %193 : vector<2x30xf32>
    %195 = vector.extract_strided_slice %194 {offsets = [0, 0], sizes = [2, 10], strides = [1, 1]} : vector<2x30xf32> to vector<2x10xf32>
    %196 = vector.extract_strided_slice %194 {offsets = [0, 10], sizes = [2, 10], strides = [1, 1]} : vector<2x30xf32> to vector<2x10xf32>
    %197 = vector.extract_strided_slice %194 {offsets = [0, 20], sizes = [2, 10], strides = [1, 1]} : vector<2x30xf32> to vector<2x10xf32>
    %198 = vector.extract_strided_slice %188 {offsets = [0, 30], sizes = [2, 10], strides = [1, 1]} : vector<2x40xf32> to vector<2x10xf32>
    %199 = math.tanh %198 : vector<2x10xf32>
    %200 = arith.mulf %196, %182 : vector<2x10xf32>
    %201 = arith.mulf %195, %199 : vector<2x10xf32>
    %202 = arith.addf %200, %201 : vector<2x10xf32>
    %203 = math.tanh %202 : vector<2x10xf32>
    %204 = arith.mulf %197, %203 : vector<2x10xf32>
    %c16 = arith.constant 16 : index
    %c0_54 = arith.constant 0 : index
    %205 = vector.load %arg18[%c16, %c0_54] : memref<44x10xf32, #tpu.memory_space<vmem>>, vector<2x10xf32>
    tpu.vector_store %arg18[%c16, %c0_54], %204 {strides = array<i32>} : memref<44x10xf32, #tpu.memory_space<vmem>>, vector<2x10xf32>,
    %206 = vector.extract_strided_slice %21 {offsets = [18, 0], sizes = [2, 40], strides = [1, 1]} : vector<22x40xf32> to vector<2x40xf32>
    %cst_55 = arith.constant dense<0.000000e+00> : vector<2x40xf32>
    %207 = tpu.matmul %204, %23, %cst_55 {dimension_numbers = #tpu.dot_dimension_numbers<[1], [0], [0], [1], [0, 0, 1, 1], [], []>} : vector<2x10xf32>, vector<10x40xf32>, vector<2x40xf32> -> vector<2x40xf32>
    %208 = arith.addf %206, %207 : vector<2x40xf32>
    %209 = vector.extract_strided_slice %208 {offsets = [0, 0], sizes = [2, 30], strides = [1, 1]} : vector<2x40xf32> to vector<2x30xf32>
    %210 = arith.negf %209 : vector<2x30xf32>
    %211 = math.exp %210 : vector<2x30xf32>
    %cst_56 = arith.constant 1.000000e+00 : f32
    %212 = vector.broadcast %cst_56 : f32 to vector<2x30xf32>
    %213 = arith.addf %212, %211 : vector<2x30xf32>
    %214 = arith.divf %212, %213 : vector<2x30xf32>
    %215 = vector.extract_strided_slice %214 {offsets = [0, 0], sizes = [2, 10], strides = [1, 1]} : vector<2x30xf32> to vector<2x10xf32>
    %216 = vector.extract_strided_slice %214 {offsets = [0, 10], sizes = [2, 10], strides = [1, 1]} : vector<2x30xf32> to vector<2x10xf32>
    %217 = vector.extract_strided_slice %214 {offsets = [0, 20], sizes = [2, 10], strides = [1, 1]} : vector<2x30xf32> to vector<2x10xf32>
    %218 = vector.extract_strided_slice %208 {offsets = [0, 30], sizes = [2, 10], strides = [1, 1]} : vector<2x40xf32> to vector<2x10xf32>
    %219 = math.tanh %218 : vector<2x10xf32>
    %220 = arith.mulf %216, %202 : vector<2x10xf32>
    %221 = arith.mulf %215, %219 : vector<2x10xf32>
    %222 = arith.addf %220, %221 : vector<2x10xf32>
    %223 = math.tanh %222 : vector<2x10xf32>
    %224 = arith.mulf %217, %223 : vector<2x10xf32>
    %c18 = arith.constant 18 : index
    %c0_57 = arith.constant 0 : index
    %225 = vector.load %arg18[%c18, %c0_57] : memref<44x10xf32, #tpu.memory_space<vmem>>, vector<2x10xf32>
    tpu.vector_store %arg18[%c18, %c0_57], %224 {strides = array<i32>} : memref<44x10xf32, #tpu.memory_space<vmem>>, vector<2x10xf32>,
    %226 = vector.extract_strided_slice %21 {offsets = [20, 0], sizes = [2, 40], strides = [1, 1]} : vector<22x40xf32> to vector<2x40xf32>
    %cst_58 = arith.constant dense<0.000000e+00> : vector<2x40xf32>
    %227 = tpu.matmul %224, %23, %cst_58 {dimension_numbers = #tpu.dot_dimension_numbers<[1], [0], [0], [1], [0, 0, 1, 1], [], []>} : vector<2x10xf32>, vector<10x40xf32>, vector<2x40xf32> -> vector<2x40xf32>
    %228 = arith.addf %226, %227 : vector<2x40xf32>
    %229 = vector.extract_strided_slice %228 {offsets = [0, 0], sizes = [2, 30], strides = [1, 1]} : vector<2x40xf32> to vector<2x30xf32>
    %230 = arith.negf %229 : vector<2x30xf32>
    %231 = math.exp %230 : vector<2x30xf32>
    %cst_59 = arith.constant 1.000000e+00 : f32
    %232 = vector.broadcast %cst_59 : f32 to vector<2x30xf32>
    %233 = arith.addf %232, %231 : vector<2x30xf32>
    %234 = arith.divf %232, %233 : vector<2x30xf32>
    %235 = vector.extract_strided_slice %234 {offsets = [0, 0], sizes = [2, 10], strides = [1, 1]} : vector<2x30xf32> to vector<2x10xf32>
    %236 = vector.extract_strided_slice %234 {offsets = [0, 10], sizes = [2, 10], strides = [1, 1]} : vector<2x30xf32> to vector<2x10xf32>
    %237 = vector.extract_strided_slice %234 {offsets = [0, 20], sizes = [2, 10], strides = [1, 1]} : vector<2x30xf32> to vector<2x10xf32>
    %238 = vector.extract_strided_slice %228 {offsets = [0, 30], sizes = [2, 10], strides = [1, 1]} : vector<2x40xf32> to vector<2x10xf32>
    %239 = math.tanh %238 : vector<2x10xf32>
    %240 = arith.mulf %236, %222 : vector<2x10xf32>
    %241 = arith.mulf %235, %239 : vector<2x10xf32>
    %242 = arith.addf %240, %241 : vector<2x10xf32>
    %243 = math.tanh %242 : vector<2x10xf32>
    %244 = arith.mulf %237, %243 : vector<2x10xf32>
    %c20 = arith.constant 20 : index
    %c0_60 = arith.constant 0 : index
    %245 = vector.load %arg18[%c20, %c0_60] : memref<44x10xf32, #tpu.memory_space<vmem>>, vector<2x10xf32>
    tpu.vector_store %arg18[%c20, %c0_60], %244 {strides = array<i32>} : memref<44x10xf32, #tpu.memory_space<vmem>>, vector<2x10xf32>,
    %c0_61 = arith.constant 0 : index
    %c0_62 = arith.constant 0 : index
    %246 = vector.load %arg18[%c0_61, %c0_62] : memref<44x10xf32, #tpu.memory_space<vmem>>, vector<44x10xf32>
    %247 = vector.extract_strided_slice %246 {offsets = [0, 0], sizes = [22, 10], strides = [1, 1]} : vector<44x10xf32> to vector<22x10xf32>
    %c0_63 = arith.constant 0 : index
    %c0_64 = arith.constant 0 : index
    %248 = vector.load %arg12[%c0_63, %c0_64] : memref<22x44xf32, #tpu.memory_space<vmem>>, vector<22x44xf32>
    %cst_65 = arith.constant dense<0.000000e+00> : vector<22x10xf32>
    %249 = tpu.matmul %248, %246, %cst_65 {dimension_numbers = #tpu.dot_dimension_numbers<[1], [0], [0], [1], [0, 0, 1, 1], [], []>} : vector<22x44xf32>, vector<44x10xf32>, vector<22x10xf32> -> vector<22x10xf32>
    %c0_66 = arith.constant 0 : index
    %c0_67 = arith.constant 0 : index
    %250 = vector.load %arg13[%c0_66, %c0_67] : memref<22x1xf32, #tpu.memory_space<vmem>>, vector<22x1xf32>
    %251 = vector.broadcast %250 : vector<22x1xf32> to vector<22x10xf32>
    %252 = arith.addf %249, %251 : vector<22x10xf32>
    %253 = arith.negf %252 : vector<22x10xf32>
    %254 = math.exp %253 : vector<22x10xf32>
    %cst_68 = arith.constant 1.000000e+00 : f32
    %255 = vector.broadcast %cst_68 : f32 to vector<22x10xf32>
    %256 = arith.addf %255, %254 : vector<22x10xf32>
    %257 = arith.divf %255, %256 : vector<22x10xf32>
    %258 = arith.mulf %257, %247 : vector<22x10xf32>
    %259 = vector.extract_strided_slice %258 {offsets = [0, 0], sizes = [2, 10], strides = [1, 1]} : vector<22x10xf32> to vector<2x10xf32>
    %c0_69 = arith.constant 0 : index
    %c0_70 = arith.constant 0 : index
    %260 = vector.load %arg19[%c0_69, %c0_70] : memref<2x110xf32, #tpu.memory_space<vmem>>, vector<2x10xf32>
    tpu.vector_store %arg19[%c0_69, %c0_70], %259 {strides = array<i32>} : memref<2x110xf32, #tpu.memory_space<vmem>>, vector<2x10xf32>,
    %261 = vector.extract_strided_slice %258 {offsets = [2, 0], sizes = [2, 10], strides = [1, 1]} : vector<22x10xf32> to vector<2x10xf32>
    %c0_71 = arith.constant 0 : index
    %c10_72 = arith.constant 10 : index
    %262 = vector.load %arg19[%c0_71, %c10_72] : memref<2x110xf32, #tpu.memory_space<vmem>>, vector<2x10xf32>
    tpu.vector_store %arg19[%c0_71, %c10_72], %261 {strides = array<i32>} : memref<2x110xf32, #tpu.memory_space<vmem>>, vector<2x10xf32>,
    %263 = vector.extract_strided_slice %258 {offsets = [4, 0], sizes = [2, 10], strides = [1, 1]} : vector<22x10xf32> to vector<2x10xf32>
    %c0_73 = arith.constant 0 : index
    %c20_74 = arith.constant 20 : index
    %264 = vector.load %arg19[%c0_73, %c20_74] : memref<2x110xf32, #tpu.memory_space<vmem>>, vector<2x10xf32>
    tpu.vector_store %arg19[%c0_73, %c20_74], %263 {strides = array<i32>} : memref<2x110xf32, #tpu.memory_space<vmem>>, vector<2x10xf32>,
    %265 = vector.extract_strided_slice %258 {offsets = [6, 0], sizes = [2, 10], strides = [1, 1]} : vector<22x10xf32> to vector<2x10xf32>
    %c0_75 = arith.constant 0 : index
    %c30 = arith.constant 30 : index
    %266 = vector.load %arg19[%c0_75, %c30] : memref<2x110xf32, #tpu.memory_space<vmem>>, vector<2x10xf32>
    tpu.vector_store %arg19[%c0_75, %c30], %265 {strides = array<i32>} : memref<2x110xf32, #tpu.memory_space<vmem>>, vector<2x10xf32>,
    %267 = vector.extract_strided_slice %258 {offsets = [8, 0], sizes = [2, 10], strides = [1, 1]} : vector<22x10xf32> to vector<2x10xf32>
    %c0_76 = arith.constant 0 : index
    %c40 = arith.constant 40 : index
    %268 = vector.load %arg19[%c0_76, %c40] : memref<2x110xf32, #tpu.memory_space<vmem>>, vector<2x10xf32>
    tpu.vector_store %arg19[%c0_76, %c40], %267 {strides = array<i32>} : memref<2x110xf32, #tpu.memory_space<vmem>>, vector<2x10xf32>,
    %269 = vector.extract_strided_slice %258 {offsets = [10, 0], sizes = [2, 10], strides = [1, 1]} : vector<22x10xf32> to vector<2x10xf32>
    %c0_77 = arith.constant 0 : index
    %c50 = arith.constant 50 : index
    %270 = vector.load %arg19[%c0_77, %c50] : memref<2x110xf32, #tpu.memory_space<vmem>>, vector<2x10xf32>
    tpu.vector_store %arg19[%c0_77, %c50], %269 {strides = array<i32>} : memref<2x110xf32, #tpu.memory_space<vmem>>, vector<2x10xf32>,
    %271 = vector.extract_strided_slice %258 {offsets = [12, 0], sizes = [2, 10], strides = [1, 1]} : vector<22x10xf32> to vector<2x10xf32>
    %c0_78 = arith.constant 0 : index
    %c60 = arith.constant 60 : index
    %272 = vector.load %arg19[%c0_78, %c60] : memref<2x110xf32, #tpu.memory_space<vmem>>, vector<2x10xf32>
    tpu.vector_store %arg19[%c0_78, %c60], %271 {strides = array<i32>} : memref<2x110xf32, #tpu.memory_space<vmem>>, vector<2x10xf32>,
    %273 = vector.extract_strided_slice %258 {offsets = [14, 0], sizes = [2, 10], strides = [1, 1]} : vector<22x10xf32> to vector<2x10xf32>
    %c0_79 = arith.constant 0 : index
    %c70 = arith.constant 70 : index
    %274 = vector.load %arg19[%c0_79, %c70] : memref<2x110xf32, #tpu.memory_space<vmem>>, vector<2x10xf32>
    tpu.vector_store %arg19[%c0_79, %c70], %273 {strides = array<i32>} : memref<2x110xf32, #tpu.memory_space<vmem>>, vector<2x10xf32>,
    %275 = vector.extract_strided_slice %258 {offsets = [16, 0], sizes = [2, 10], strides = [1, 1]} : vector<22x10xf32> to vector<2x10xf32>
    %c0_80 = arith.constant 0 : index
    %c80 = arith.constant 80 : index
    %276 = vector.load %arg19[%c0_80, %c80] : memref<2x110xf32, #tpu.memory_space<vmem>>, vector<2x10xf32>
    tpu.vector_store %arg19[%c0_80, %c80], %275 {strides = array<i32>} : memref<2x110xf32, #tpu.memory_space<vmem>>, vector<2x10xf32>,
    %277 = vector.extract_strided_slice %258 {offsets = [18, 0], sizes = [2, 10], strides = [1, 1]} : vector<22x10xf32> to vector<2x10xf32>
    %c0_81 = arith.constant 0 : index
    %c90 = arith.constant 90 : index
    %278 = vector.load %arg19[%c0_81, %c90] : memref<2x110xf32, #tpu.memory_space<vmem>>, vector<2x10xf32>
    tpu.vector_store %arg19[%c0_81, %c90], %277 {strides = array<i32>} : memref<2x110xf32, #tpu.memory_space<vmem>>, vector<2x10xf32>,
    %279 = vector.extract_strided_slice %258 {offsets = [20, 0], sizes = [2, 10], strides = [1, 1]} : vector<22x10xf32> to vector<2x10xf32>
    %c0_82 = arith.constant 0 : index
    %c100 = arith.constant 100 : index
    %280 = vector.load %arg19[%c0_82, %c100] : memref<2x110xf32, #tpu.memory_space<vmem>>, vector<2x10xf32>
    tpu.vector_store %arg19[%c0_82, %c100], %279 {strides = array<i32>} : memref<2x110xf32, #tpu.memory_space<vmem>>, vector<2x10xf32>,
    %c0_83 = arith.constant 0 : index
    %c0_84 = arith.constant 0 : index
    %281 = vector.load %arg19[%c0_83, %c0_84] : memref<2x110xf32, #tpu.memory_space<vmem>>, vector<2x110xf32>
    %c0_85 = arith.constant 0 : index
    %c0_86 = arith.constant 0 : index
    %282 = vector.load %arg14[%c0_85, %c0_86] : memref<110x4xf32, #tpu.memory_space<vmem>>, vector<110x4xf32>
    %cst_87 = arith.constant dense<0.000000e+00> : vector<2x4xf32>
    %283 = tpu.matmul %281, %282, %cst_87 {dimension_numbers = #tpu.dot_dimension_numbers<[1], [0], [0], [1], [0, 0, 1, 1], [], []>} : vector<2x110xf32>, vector<110x4xf32>, vector<2x4xf32> -> vector<2x4xf32>
    %c0_88 = arith.constant 0 : index
    %c0_89 = arith.constant 0 : index
    %284 = vector.load %arg4[%c0_88, %c0_89] : memref<2x30xf32, #tpu.memory_space<vmem>>, vector<2x30xf32>
    %c0_90 = arith.constant 0 : index
    %c0_91 = arith.constant 0 : index
    %285 = vector.load %arg15[%c0_90, %c0_91] : memref<30x4xf32, #tpu.memory_space<vmem>>, vector<30x4xf32>
    %cst_92 = arith.constant dense<0.000000e+00> : vector<2x4xf32>
    %286 = tpu.matmul %284, %285, %cst_92 {dimension_numbers = #tpu.dot_dimension_numbers<[1], [0], [0], [1], [0, 0, 1, 1], [], []>} : vector<2x30xf32>, vector<30x4xf32>, vector<2x4xf32> -> vector<2x4xf32>
    %287 = arith.addf %283, %286 : vector<2x4xf32>
    %c0_93 = arith.constant 0 : index
    %c0_94 = arith.constant 0 : index
    %288 = vector.load %arg16[%c0_93, %c0_94] : memref<1x4xf32, #tpu.memory_space<vmem>>, vector<1x4xf32>
    %289 = vector.broadcast %288 : vector<1x4xf32> to vector<2x4xf32>
    %290 = arith.addf %287, %289 : vector<2x4xf32>
    %c0_95 = arith.constant 0 : index
    %c0_96 = arith.constant 0 : index
    %291 = vector.load %arg17[%c0_95, %c0_96] : memref<2x4xf32, #tpu.memory_space<vmem>>, vector<2x4xf32>
    tpu.vector_store %arg17[%c0_95, %c0_96], %290 {strides = array<i32>} : memref<2x4xf32, #tpu.memory_space<vmem>>, vector<2x4xf32>,
    return
  }
}

</mosaic_0001>

<bundles_post_ra>
// kernel: holistic_forward.1
= control target key start
LH: loop header
LB: loop body
LE: loop exit
PB: predicated region body
PF: predicated region fallthrough
CT: control target
= control target key end

     0   :  { %s2354_s0 = inlined_call_operand.vmem [shape: f32[6,32], index: 0, kind: input, shape index: {}]   ;;  %s2355_s1 = inlined_call_operand.vmem [shape: f32[16,32], index: 1, kind: input, shape index: {}]   ;;  %s2356_s2 = inlined_call_operand.vmem [shape: f32[2,10], index: 2, kind: input, shape index: {}]   ;;  %s2357_s3 = inlined_call_operand.vmem [shape: f32[2,10], index: 3, kind: input, shape index: {}]   ;;  %s2358_s4 = inlined_call_operand.vmem [shape: f32[2,30], index: 4, kind: input, shape index: {}]   ;;  %s2359_s5 = inlined_call_operand.vmem [shape: f32[32,320], index: 5, kind: input, shape index: {}]   ;;  %s2360_s6 = inlined_call_operand.vmem [shape: f32[1,320], index: 6, kind: input, shape index: {}]   ;;  %s2361_s7 = inlined_call_operand.vmem [shape: f32[32,320], index: 7, kind: input, shape index: {}]   ;;  %s2362_s8 = inlined_call_operand.vmem [shape: f32[1,320], index: 8, kind: input, shape index: {}]   ;;  %s2363_s9 = inlined_call_operand.vmem [shape: f32[320,50], index: 9, kind: input, shape index: {}]   ;;  %s2364_s10 = inlined_call_operand.vmem [shape: f32[1,50], index: 10, kind: input, shape index: {}]   ;;  %s2365_s11 = inlined_call_operand.vmem [shape: f32[10,40], index: 11, kind: input, shape index: {}]   ;;  %s2366_s12 = inlined_call_operand.vmem [shape: f32[22,44], index: 12, kind: input, shape index: {}]   ;;  %s2367_s13 = inlined_call_operand.vmem [shape: f32[22,1], index: 13, kind: input, shape index: {}]   ;;  %s2368_s14 = inlined_call_operand.vmem [shape: f32[110,4], index: 14, kind: input, shape index: {}]   ;;  %s2369_s15 = inlined_call_operand.vmem [shape: f32[30,4], index: 15, kind: input, shape index: {}]   ;;  %s2370_s16 = inlined_call_operand.vmem [shape: f32[1,4], index: 16, kind: input, shape index: {}]   ;;  %s2371_s17 = inlined_call_operand.hbm [shape: f32[2,4], index: 17, kind: output, shape index: {}]  }
   0x1   :  { %2373 = sst [smem:[#allocation7_spill]] %s2354_s0 }
   0x2   :  { %2374 = sst [smem:[#allocation8_spill]] %s2355_s1 }
   0x3   :  { %v67_v0 = vld [vmem:[%s2359_s5 + $0x48] sm:$0xff]  ;;  %v68_v1 = vld [vmem:[%s2359_s5 + $0x50] sm:$0xff]  ;;  %v65_v3 = vld [vmem:[%s2359_s5 + $0x38] sm:$0xff]  ;;  %s2375_s29 = sld [smem:[#allocation7_spill]]  ;;  %vm78_vm0 = vcmask 261120  }
   0x4   :  { %v64_v2 = vld [vmem:[%s2359_s5 + $0x30] sm:$0xff]  ;;  %94 = vmatpush.msra.mxu0 %v67_v0  ;;  %114 = vmatpush.msra.mxu1 %v68_v1  ;;  %v61_v4 = vld [vmem:[%s2359_s5 + $0x18] sm:$0xff]  ;;  %v62_v5 = vld [vmem:[%s2359_s5 + $0x20] sm:$0xff]  ;;  %s2376_s20 = sld [smem:[#allocation8_spill]] }
   0x5   :  { %v58_v6 = vld [vmem:[%s2359_s5] sm:$0xff]  ;;  %v59_v7 = vld [vmem:[%s2359_s5 + $0x8] sm:$0xff]  ;;  %v69_v10 = vld [vmem:[%s2359_s5 + $0x58] sm:$0xff] }
   0x6   :  { %95 = vmatpush.msra.mxu0 %v64_v2  ;;  %115 = vmatpush.msra.mxu1 %v65_v3  ;;  %v153_v8 = vld [vmem:[%s2361_s7 + $0x48] sm:$0xff]  ;;  %v150_v11 = vld [vmem:[%s2361_s7 + $0x30] sm:$0xff]  ;;  %v66_v13 = vld [vmem:[%s2359_s5 + $0x40] sm:$0xff] }
   0x7   :  { %182 = vmatpush.msra.mxu3 %v153_v8  ;;  %v154_v12 = vld [vmem:[%s2361_s7 + $0x50] sm:$0xff]  ;;  %v147_v14 = vld [vmem:[%s2361_s7 + $0x18] sm:$0xff]  ;;  %v63_v16 = vld [vmem:[%s2359_s5 + $0x28] sm:$0xff] }
   0x8   :  { %96 = vmatpush.msra.mxu0 %v61_v4  ;;  %116 = vmatpush.msra.mxu1 %v62_v5  ;;  %v151_v15 = vld [vmem:[%s2361_s7 + $0x38] sm:$0xff]  ;;  %v144_v17 = vld [vmem:[%s2361_s7] sm:$0xff]  ;;  %v60_v21 = vld [vmem:[%s2359_s5 + $0x10] sm:$0xff] }
   0x9   :  { %v57_v9 = vld [vmem:[%s2375_s29] sm:$0x3f]  ;;  %183 = vmatpush.msra.mxu3 %v150_v11  ;;  %v254_v18 = vld [vmem:[%s2363_s9 + $0x78] sm:$0xff]  ;;  %v145_v23 = vld [vmem:[%s2361_s7 + $0x8] sm:$0xff] }
   0xa   :  { %97 = vmatpush.msra.mxu0 %v58_v6  ;;  %117 = vmatpush.msra.mxu1 %v59_v7  ;;  %v142_v19 = vld [vmem:[%s2376_s20] sm:$0xff]  ;;  %v270_v22 = vld [vmem:[%s2363_s9 + $0xf8] sm:$0xff]  ;;  %v269_v25 = vld [vmem:[%s2363_s9 + $0xf0] sm:$0xff] }
   0xb   :  { %1553 = vmatmul.msk.f32.vlgmr.msra.gmra.mxu0 %vm78_vm0, %v57_v9  ;;  %1554 = vmatmul.msk.f32.vlgmr.msra.gmra.mxu1 %vm78_vm0, %v57_v9  ;;  %v148_v20 = vld [vmem:[%s2361_s7 + $0x20] sm:$0xff]  ;;  %v155_v24 = vld [vmem:[%s2361_s7 + $0x58] sm:$0xff]  ;;  %v253_v26 = vld [vmem:[%s2363_s9 + $0x70] sm:$0xff] }
   0xc   :  { %134 = vmatpush.msrb.mxu1 %v69_v10  ;;  %205 = vmatpush.msrb.mxu0 %v154_v12  ;;  %v152_v27 = vld [vmem:[%s2361_s7 + $0x40] sm:$0xff]  ;;  %v268_v28 = vld [vmem:[%s2363_s9 + $0xe8] sm:$0xff]  ;;  %v146_v31 = vld [vmem:[%s2361_s7 + $0x10] sm:$0xff] }
   0xd   :  { %184 = vmatpush.msra.mxu3 %v147_v14  ;;  %283 = vmatpush.msra.mxu2 %v254_v18  ;;  %v252_v29 = vld [vmem:[%s2363_s9 + $0x68] sm:$0xff]  ;;  %v251_v33 = vld [vmem:[%s2363_s9 + $0x60] sm:$0xff]  ;;  %v250_v35 = vld [vmem:[%s2363_s9 + $0x58] sm:$0xff] }
   0xe   :  { %135 = vmatpush.msrb.mxu1 %v66_v13  ;;  %206 = vmatpush.msrb.mxu0 %v151_v15  ;;  %v149_v30 = vld [vmem:[%s2361_s7 + $0x28] sm:$0xff]  ;;  %v267_v34 = vld [vmem:[%s2363_s9 + $0xe0] sm:$0xff] }
   0xf   :  { %185 = vmatpush.msra.mxu3 %v144_v17  ;;  %284 = vmatpush.msra.mxu2 %v253_v26  ;;  %v143_v32 = vld [vmem:[%s2376_s20 + $0x8] sm:$0xff] }
  0x10   :  { %136 = vmatpush.msrb.mxu1 %v63_v16  ;;  %1556 = vmatmul.msk.f32.vlgmr.msra.gmra.mxu3 %vm78_vm0, %v142_v19 }
  0x11   :  { %207 = vmatpush.msrb.mxu0 %v148_v20  ;;  %303 = vmatpush.msrb.mxu3 %v270_v22 }
  0x12   :  { %137 = vmatpush.msrb.mxu1 %v60_v21  ;;  %285 = vmatpush.msra.mxu2 %v252_v29 }
  0x13   :  { %1555 = vmatmul.msk.f32.vlgmr.msrb.gmra.mxu1 %vm78_vm0, %v57_v9  ;;  %208 = vmatpush.msrb.mxu0 %v145_v23 }
  0x14   :  { %228 = vmatpush.msra.mxu1 %v155_v24  ;;  %1558 = vmatmul.msk.f32.vlgmr.msrb.gmra.mxu0 %vm78_vm0, %v142_v19 }
  0x15   :  { %304 = vmatpush.msrb.mxu3 %v269_v25  ;;  %372 = vmatpush.msra.mxu0 %v270_v22 }
  0x16   :  { %229 = vmatpush.msra.mxu1 %v152_v27 }
  0x17   :  { %305 = vmatpush.msrb.mxu3 %v268_v28  ;;  %373 = vmatpush.msra.mxu0 %v269_v25 }
  0x18   :  { %230 = vmatpush.msra.mxu1 %v149_v30 }
  0x19   :  { %22 = vsyncpa [#allocation5], 0  ;;  %1557 = vmatmul.msk.f32.gmra.mxu3 %vm78_vm0, %v143_v32  ;;  %v266_v36 = vld [vmem:[%s2363_s9 + $0xd8] sm:$0xff]  ;;  %286 = vmatpush.msra.mxu2 %v251_v33  ;;  %v249_v37 = vld [vmem:[%s2363_s9 + $0x50] sm:$0xff]  ;;  %vm447_vm1 = vcmask 1041408   ;;  %vm279_vm2 = vcmask 523264  }
  0x1a   :  { %231 = vmatpush.msra.mxu1 %v146_v31  ;;  %306 = vmatpush.msrb.mxu3 %v267_v34  ;;  %v265_v38 = vld [vmem:[%s2363_s9 + $0xd0] sm:$0xff]  ;;  %v248_v39 = vld [vmem:[%s2363_s9 + $0x48] sm:$0xff]  ;;  %v247_v41 = vld [vmem:[%s2363_s9 + $0x40] sm:$0xff]  ;;  %vm435_vm3 = vcmask 80896   ;;  %s1753_s20 = smov 20   ;;  %s1754_s23 = smov 10  }
  0x1b   :  { %1560 = vmatmul.msk.f32.vlgmr.msra.gmra.mxu1 %vm78_vm0, %v142_v19  ;;  %287 = vmatpush.msra.mxu2 %v250_v35  ;;  %v264_v40 = vld [vmem:[%s2363_s9 + $0xc8] sm:$0xff]  ;;  %v263_v42 = vld [vmem:[%s2363_s9 + $0xc0] sm:$0xff]  ;;  %v246_v43 = vld [vmem:[%s2363_s9 + $0x38] sm:$0xff]  ;;  %vm420_vm4 = vcmask 1045504   ;;  %vm438_vm5 = vcmask 78848   ;;  %vm1312_vm6 = vcmask 1043456  }
  0x1c   :  { %1559 = vmatmul.msk.f32.gmra.mxu0 %vm78_vm0, %v143_v32  ;;  %307 = vmatpush.msrb.mxu3 %v266_v36  ;;  %v262_v44 = vld [vmem:[%s2363_s9 + $0xb8] sm:$0xff]  ;;  %v245_v45 = vld [vmem:[%s2363_s9 + $0x30] sm:$0xff]  ;;  %v244_v47 = vld [vmem:[%s2363_s9 + $0x28] sm:$0xff]  ;;  %vm521_vm11 = vcmask 74752   ;;  %s1759_s21 = smov 50   ;;  %s1761_s22 = smov 90  }
  0x1d   :  { %288 = vmatpush.msra.mxu2 %v249_v37  ;;  %349 = vmatpush.msrb.mxu1 %v254_v18  ;;  %v261_v46 = vld [vmem:[%s2363_s9 + $0xb0] sm:$0xff]  ;;  %v260_v48 = vld [vmem:[%s2363_s9 + $0xa8] sm:$0xff]  ;;  %v243_v49 = vld [vmem:[%s2363_s9 + $0x20] sm:$0xff]  ;;  %s1765_s0 = smov [#allocation4]   ;;  %s1544_s18 = sshll.u32 %s2371_s17, 4  ;;  %s1545_s18 = int_to_ptr.hbm [resolvable:$true] %s1544_s18 }
  0x1e   :  { %308 = vmatpush.msrb.mxu3 %v265_v38  ;;  %374 = vmatpush.msra.mxu0 %v268_v28  ;;  %v259_v50 = vld [vmem:[%s2363_s9 + $0xa0] sm:$0xff]  ;;  %v242_v51 = vld [vmem:[%s2363_s9 + $0x18] sm:$0xff]  ;;  %v241_v53 = vld [vmem:[%s2363_s9 + $0x10] sm:$0xff]  ;;  %s1542_s5 = sshll.u32 %s1765_s0, 4  ;;  %s1543_s5 = int_to_ptr.vmem [resolvable:$true] %s1542_s5 }
  0x1f   :  { %289 = vmatpush.msra.mxu2 %v248_v39  ;;  %350 = vmatpush.msrb.mxu1 %v253_v26  ;;  %v258_v52 = vld [vmem:[%s2363_s9 + $0x98] sm:$0xff]  ;;  %v257_v54 = vld [vmem:[%s2363_s9 + $0x90] sm:$0xff]  ;;  %v256_v55 = vld [vmem:[%s2363_s9 + $0x88] sm:$0xff] }
  0x20   :  { %309 = vmatpush.msrb.mxu3 %v264_v40  ;;  %375 = vmatpush.msra.mxu0 %v267_v34  ;;  %v255_v56 = vld [vmem:[%s2363_s9 + $0x80] sm:$0xff]  ;;  %v278_v57 = vld [vmem:[%s2363_s9 + $0x138] sm:$0xff]  ;;  %v277_v58 = vld [vmem:[%s2363_s9 + $0x130] sm:$0xff] }
  0x21   :  { %290 = vmatpush.msra.mxu2 %v247_v41  ;;  %351 = vmatpush.msrb.mxu1 %v252_v29  ;;  %v240_v59 = vld [vmem:[%s2363_s9 + $0x8] sm:$0xff]  ;;  %v239_v61 = vld [vmem:[%s2363_s9] sm:$0xff]  ;;  %v274_v63 = vld [vmem:[%s2363_s9 + $0x118] sm:$0xff] }
  0x22   :  { %310 = vmatpush.msrb.mxu3 %v263_v42  ;;  %376 = vmatpush.msra.mxu0 %v266_v36  ;;  %v276_v60 = vld [vmem:[%s2363_s9 + $0x128] sm:$0xff]  ;;  %v275_v62 = vld [vmem:[%s2363_s9 + $0x120] sm:$0xff]  ;;  %v273_v0 = vld [vmem:[%s2363_s9 + $0x110] sm:$0xff] }
  0x23   :  { %1561 = vmatmul.msk.f32.gmra.mxu1 %vm78_vm0, %v143_v32  ;;  %291 = vmatpush.msra.mxu2 %v246_v43  ;;  %v272_v1 = vld [vmem:[%s2363_s9 + $0x108] sm:$0xff]  ;;  %v271_v2 = vld [vmem:[%s2363_s9 + $0x100] sm:$0xff]  ;;  %s1758_s9 = smov 60  }
  0x24   :  { %311 = vmatpush.msrb.mxu3 %v262_v44  ;;  %352 = vmatpush.msrb.mxu1 %v251_v33  ;;  %v2069_v3 = vld [vmem:[%s2365_s11 + $0x8] sm:$0x3]  ;;  %v2078_v4 = vld [vmem:[%s2365_s11] sm:$0xff]  ;;  %s1760_s11 = smov 40  }
  0x25   :  { %292 = vmatpush.msra.mxu2 %v245_v45  ;;  %377 = vmatpush.msra.mxu0 %v265_v38  ;;  %v70_v5 = vld [vmem:[%s2360_s6] sm:$0x7]  ;;  %s1762_s6 = smov 80  }
  0x26   :  { %312 = vmatpush.msrb.mxu3 %v261_v46  ;;  %353 = vmatpush.msrb.mxu1 %v250_v35  ;;  %v72_v6 = vperm.slane %v70_v5, 0  ;;  %v73_v7 = vperm.slane %v70_v5, 1  ;;  %v74_v12 = vperm.slane %v70_v5, 2  ;;  %v156_v13 = vld [vmem:[%s2362_s8] sm:$0x7]  ;;  %s1763_s8 = smov 70  }
  0x27   :  { %293 = vmatpush.msra.mxu2 %v244_v47  ;;  %378 = vmatpush.msra.mxu0 %v264_v40  ;;  %v159_v14 = vperm.slane %v156_v13, 1  ;;  %v158_v17 = vperm.slane %v156_v13, 0  ;;  %v160_v21 = vperm.slane %v156_v13, 2  ;;  %v442_v24 = vld [vmem:[%s2356_s2] sm:$0x3]  ;;  %s1764_s2 = smov 100  }
  0x28   :  { %313 = vmatpush.msrb.mxu3 %v260_v48  ;;  %354 = vmatpush.msrb.mxu1 %v249_v37  ;;  %v443_v37 = vld [vmem:[%s2357_s3] sm:$0x3]  ;;  %s1755_s3 = smov 98  }
  0x29   :  { %294 = vmatpush.msra.mxu2 %v243_v49  ;;  %379 = vmatpush.msra.mxu0 %v263_v42 }
  0x2a   :  { %314 = vmatpush.msrb.mxu3 %v259_v50  ;;  %355 = vmatpush.msrb.mxu1 %v248_v39 }
  0x2b   :  { %295 = vmatpush.msra.mxu2 %v242_v51  ;;  %380 = vmatpush.msra.mxu0 %v262_v44 }
  0x2c   :  { %315 = vmatpush.msrb.mxu3 %v258_v52  ;;  %356 = vmatpush.msrb.mxu1 %v247_v41 }
  0x2d   :  { %296 = vmatpush.msra.mxu2 %v241_v53  ;;  %381 = vmatpush.msra.mxu0 %v261_v46 }
  0x2e   :  { %316 = vmatpush.msrb.mxu3 %v257_v54  ;;  %357 = vmatpush.msrb.mxu1 %v246_v43  ;;  %v1625_v43 = vld [vmem:[%s2364_s10] ss:$0 sm:$0xff] }
  0x2f   :  { %382 = vmatpush.msra.mxu0 %v260_v48  ;;  %297 = vmatpush.msra.mxu2 %v240_v59 }
  0x30   :  { %317 = vmatpush.msrb.mxu3 %v256_v55  ;;  %358 = vmatpush.msrb.mxu1 %v245_v45 }
  0x31   :  { %383 = vmatpush.msra.mxu0 %v259_v50  ;;  %298 = vmatpush.msra.mxu2 %v239_v61 }
  0x32   :  { %318 = vmatpush.msrb.mxu3 %v255_v56  ;;  %359 = vmatpush.msrb.mxu1 %v244_v47 }
  0x33   :  { %384 = vmatpush.msra.mxu0 %v258_v52  ;;  %403 = vmatpush.msrb.mxu2 %v278_v57 }
  0x34   :  { %331 = vmatpush.msra.mxu3 %v278_v57  ;;  %360 = vmatpush.msrb.mxu1 %v243_v49 }
  0x35   :  { %385 = vmatpush.msra.mxu0 %v257_v54  ;;  %404 = vmatpush.msrb.mxu2 %v277_v58 }
  0x36   :  { %332 = vmatpush.msra.mxu3 %v277_v58  ;;  %361 = vmatpush.msrb.mxu1 %v242_v51 }
  0x37   :  { %386 = vmatpush.msra.mxu0 %v256_v55  ;;  %405 = vmatpush.msrb.mxu2 %v276_v60 }
  0x38   :  { %362 = vmatpush.msrb.mxu1 %v241_v53  ;;  %333 = vmatpush.msra.mxu3 %v276_v60 }
  0x39   :  { %387 = vmatpush.msra.mxu0 %v255_v56  ;;  %406 = vmatpush.msrb.mxu2 %v275_v62 }
  0x3a   :  { %363 = vmatpush.msrb.mxu1 %v240_v59  ;;  %334 = vmatpush.msra.mxu3 %v275_v62 }
  0x3b   :  { %407 = vmatpush.msrb.mxu2 %v274_v63  ;;  %1586 = vmatpush.msk.msrb.mxu0 %vm447_vm1, %v2069_v3 }
  0x3c   :  { %364 = vmatpush.msrb.mxu1 %v239_v61  ;;  %335 = vmatpush.msra.mxu3 %v274_v63 }
  0x3d   :  { %408 = vmatpush.msrb.mxu2 %v273_v0  ;;  %995 = vmatpush.msrb.mxu0 %v2078_v4 }
  0x3e   :  { %336 = vmatpush.msra.mxu3 %v273_v0  ;;  %1571 = vmatpush.msk.msra.mxu1 %vm447_vm1, %v2069_v3 }
  0x3f   :  { %409 = vmatpush.msrb.mxu2 %v272_v1  ;;  %497 = vrot.lane.b32.xlu1 %v443_v37, %s1753_s20 }
  0x40   :  { %337 = vmatpush.msra.mxu3 %v272_v1  ;;  %617 = vmatpush.msra.mxu1 %v2078_v4 }
  0x41   :  { %410 = vmatpush.msrb.mxu2 %v271_v2 }
  0x42   :  { %338 = vmatpush.msra.mxu3 %v271_v2 }
  0x88   :  { %v99_v8 = vpop.f32.mrf.mxu0  ;;  %v119_v9 = vpop.f32.mrf.mxu1 }
  0x89   :  { %v100_v10 = vadd.f32 %v99_v8, %v72_v6  ;;  %v120_v11 = vadd.f32 %v119_v9, %v73_v7 }
  0x8b   :  { %299 = vmatmul.f32.vlgmr.msra.gmra.mxu2 %v100_v10  ;;  %319 = vmatmul.f32.vlgmr.msrb.gmra.mxu3 %v120_v11 }
  0x8c   :  { %1565 = vmatpush.msk.msrb.mxu3 %vm447_vm1, %v2069_v3  ;;  %1580 = vmatpush.msk.msra.mxu2 %vm447_vm1, %v2069_v3 }
  0x8e   :  { %466 = vmatpush.msrb.mxu3 %v2078_v4  ;;  %843 = vmatpush.msra.mxu2 %v2078_v4 }
  0x90   :  { %v139_v15 = vpop.f32.mrf.mxu1 }
  0x91   :  { %v140_v16 = vadd.f32 %v139_v15, %v74_v12  ;;  %v210_v18 = vpop.f32.mrf.mxu0 }
  0x92   :  { %v211_v19 = vadd.f32 %v210_v18, %v159_v14 }
  0x93   :  { %1562 = vmatmul.msk.f32.vlgmr.msra.gmra.mxu3 %vm279_vm2, %v140_v16  ;;  %v187_v20 = vpop.f32.mrf.mxu3 }
  0x94   :  { %388 = vmatmul.f32.vlgmr.msra.gmra.mxu0 %v211_v19  ;;  %1568 = vmatpush.msk.msra.mxu3 %vm447_vm1, %v2069_v3  ;;  %v188_v22 = vadd.f32 %v187_v20, %v158_v17 }
  0x96   :  { %540 = vmatpush.msra.mxu3 %v2078_v4  ;;  %365 = vmatmul.f32.vlgmr.msrb.gmra.mxu1 %v188_v22 }
  0x97   :  { %1577 = vmatpush.msk.msrb.mxu1 %vm447_vm1, %v2069_v3 }
  0x98   :  { %v233_v23 = vpop.f32.mrf.mxu1 }
  0x99   :  { %v234_v25 = vadd.f32 %v233_v23, %v160_v21  ;;  %v213_v26 = vpop.f32.mrf.mxu0  ;;  %771 = vmatpush.msrb.mxu1 %v2078_v4 }
  0x9a   :  { %v214_v27 = vadd.f32 %v213_v26, %v159_v14 }
  0x9b   :  { %1563 = vmatmul.msk.f32.vlgmr.msrb.gmra.mxu2 %vm279_vm2, %v234_v25  ;;  %1566 = vmatmul.msk.f32.vlgmr.msrb.gmra.mxu3 %vm435_vm3, %v442_v24 }
  0x9c   :  { %v190_v28 = vpop.f32.mrf.mxu3  ;;  %391 = vmatmul.f32.gmra.mxu0 %v214_v27  ;;  %1574 = vmatpush.msk.msrb.mxu3 %vm447_vm1, %v2069_v3 }
  0x9d   :  { %v191_v29 = vadd.f32 %v190_v28, %v158_v17  ;;  %1592 = vmatpush.msk.msrb.mxu2 %vm447_vm1, %v2069_v3 }
  0x9e   :  { %694 = vmatpush.msrb.mxu3 %v2078_v4 }
  0x9f   :  { %368 = vmatmul.f32.gmra.mxu1 %v191_v29  ;;  %1143 = vmatpush.msrb.mxu2 %v2078_v4 }
  0xa0   :  { %v236_v30 = vpop.f32.mrf.mxu1 }
  0xa1   :  { %v237_v31 = vadd.f32 %v236_v30, %v160_v21 }
  0xa3   :  { %1564 = vmatmul.msk.f32.gmra.mxu2 %vm279_vm2, %v237_v31 }
  0xb1   :  { %v498_v16 = vpop.permute.xlu1 %497 }
 0x10e   :  { %v320_v32 = vpop.f32.mrf.mxu3  ;;  %v300_v33 = vpop.f32.mrf.mxu2 }
 0x10f   :  { %v321_v41 = vadd.f32 %v320_v32, %v300_v33 }
 0x111   :  { %v389_v34 = vpop.f32.mrf.mxu0 }
 0x113   :  { %v366_v36 = vpop.f32.mrf.mxu1 }
 0x114   :  { %v390_v38 = vadd.f32 %v389_v34, %v366_v36 }
 0x116   :  { %v340_v35 = vpop.f32.mrf.mxu3 }
 0x117   :  { %v341_v46 = vadd.f32 %v340_v35, %v321_v41 }
 0x119   :  { %v392_v45 = vpop.f32.mrf.mxu0 }
 0x11c   :  { %v369_v44 = vpop.f32.mrf.mxu1 }
 0x11d   :  { %v393_v49 = vadd.f32 %v392_v45, %v369_v44 }
 0x11e   :  { %v412_v39 = vpop.f32.mrf.mxu2  ;;  %v468_v40 = vpop.f32.mrf.mxu3 }
 0x11f   :  { %v413_v42 = vadd.f32 %v412_v39, %v390_v38  ;;  %472 = vrot.lane.b32.xlu0 %v468_v40, %s1754_s23 }
 0x121   :  { %v421_v47 = vrot.slane %v413_v42, 2 }
 0x123   :  { %v427_v48 = vsel %vm420_vm4, %v341_v46, %v421_v47 }
 0x124   :  { %v2122_v50 = vadd.f32 %v1625_v43, %v427_v48 }
 0x126   :  { %436 = vst.msk [vmem:[#allocation2 + $0x16] sm:$0xff] %vm435_vm3, %v2122_v50  ;;  %v415_v51 = vpop.f32.mrf.mxu2 }
 0x127   :  { %v416_v52 = vadd.f32 %v415_v51, %v393_v49 }
 0x129   :  { %v422_v53 = vrot.slane %v416_v52, 2 }
 0x12b   :  { %v423_v54 = vsel %vm420_vm4, %v421_v47, %v422_v53  ;;  %v2127_v55 = vadd.f32 %v1625_v43, %v422_v53 }
 0x12c   :  { %v2129_v56 = vadd.f32 %v1625_v43, %v423_v54 }
 0x12d   :  { %439 = vst.msk [vmem:[#allocation2 + $0x26] sm:$0x3f] %vm438_vm5, %v2127_v55 }
 0x12e   :  { %437 = vst.msk [vmem:[#allocation2 + $0x1e] sm:$0xff] %vm435_vm3, %v2129_v56 }
 0x134   :  { %v1280_v57 = vld [vmem:[#allocation2 + $0x28] sm:$0xf] }
 0x135   :  { %1598 = vmatpush.msk.msra.mxu0 %vm1312_vm6, %v1280_v57  ;;  %v1279_v58 = vld [vmem:[#allocation2 + $0x20] sm:$0xff]  ;;  %v1278_v59 = vld [vmem:[#allocation2 + $0x18] sm:$0xff] }
 0x137   :  { %1327 = vmatpush.msra.mxu0 %v1279_v58 }
 0x139   :  { %1328 = vmatpush.msra.mxu0 %v1278_v59 }
 0x191   :  { %v473_v60 = vpop.permute.xlu0 %472 }
 0x192   :  { %v475_v61 = vadd.f32 %v473_v60, %v2122_v50 }
 0x194   :  { %1627 = vtanh.f32 %v475_v61  ;;  %v1567_v63 = vmul.f32 -1.442695, %v475_v61 }
 0x196   :  { %1629 = vpow2.f32 %v1567_v63 }
 0x19a   :  { %v1628_v62 = vpop.eup %1627 }
 0x19b   :  { %502 = vrot.lane.b32.xlu0 %v1628_v62, %s1755_s3 }
 0x19c   :  { %v1630_v0 = vpop.eup %1629 }
 0x19d   :  { %v479_v1 = vadd.f32 1.0, %v1630_v0 }
 0x19f   :  { %1631 = vrcp.f32 %v479_v1  ;;  %v491_v9 = vand.u32 2147483648, %v479_v1  ;;  %vm485_vm8 = vweird.f32 %v479_v1  ;;  %v489_v10 = vand.u32 2147483647, %v479_v1 }
 0x1a1   :  { %v492_v12 = vor.u32 1.1754944e-38, %v491_v9  ;;  %vm490_vm10 = vcmp.eq.f32.partialorder %v489_v10, 8.507059e+37 }
 0x1a5   :  { %v1632_v2 = vpop.eup %1631 }
 0x1a6   :  { %v481_v5 = vmul.f32 %v1632_v2, %v479_v1  ;;  %vm486_vm7 = vweird.f32 %v1632_v2 }
 0x1a7   :  { %vm487_vm9 = vmor %vm485_vm8, %vm486_vm7 }
 0x1a8   :  { %v482_v6 = vsub.f32 1.0, %v481_v5 }
 0x1aa   :  { %v483_v7 = vmul.f32 %v1632_v2, %v482_v6 }
 0x1ac   :  { %v484_v8 = vadd.f32 %v1632_v2, %v483_v7 }
 0x1ae   :  { %v488_v11 = vsel %vm487_vm9, %v1632_v2, %v484_v8 }
 0x1af   :  { %v493_v13 = vsel %vm490_vm10, %v492_v12, %v488_v11 }
 0x1b0   :  { %v500_v17 = vmul.f32 %v498_v16, %v493_v13 }
 0x20d   :  { %v503_v14 = vpop.permute.xlu0 %502 }
 0x20e   :  { %v505_v15 = vmul.f32 %v503_v14, %v493_v13 }
 0x210   :  { %507 = vrot.lane.b32.xlu1 %v505_v15, %s1754_s23 }
 0x282   :  { %v508_v18 = vpop.permute.xlu1 %507 }
 0x283   :  { %v510_v19 = vadd.f32 %v508_v18, %v500_v17 }
 0x285   :  { %1633 = vtanh.f32 %v510_v19  ;;  %v572_v44 = vrot.slane %v510_v19, 6 }
 0x28b   :  { %v1634_v20 = vpop.eup %1633 }
 0x28c   :  { %513 = vrot.lane.b32.xlu2 %v1634_v20, %s1754_s23 }
 0x2e6   :  { %v514_v21 = vpop.permute.xlu2 %513 }
 0x2e7   :  { %v516_v22 = vmul.f32 %v514_v21, %v493_v13 }
 0x2e9   :  { %518 = vrot.lane.b32.xlu2 %v516_v22, %s1755_s3 }
 0x343   :  { %v519_v23 = vpop.permute.xlu2 %518 }
 0x344   :  { %522 = vst.msk [vmem:[#allocation2] sm:$0x3] %vm521_vm11, %v519_v23  ;;  %1569 = vmatmul.msk.f32.vlgmr.msra.gmra.mxu3 %vm435_vm3, %v519_v23 }
 0x345   :  { %1583 = vmatpush.msk.msra.mxu3 %vm447_vm1, %v2069_v3 }
 0x347   :  { %919 = vmatpush.msra.mxu3 %v2078_v4 }
 0x3c7   :  { %v542_v24 = vpop.f32.mrf.mxu3 }
 0x3c8   :  { %v546_v25 = vrot.slane %v542_v24, 6 }
 0x3ca   :  { %547 = vrot.lane.b32.xlu0 %v546_v25, %s1754_s23 }
 0x43c   :  { %v548_v26 = vpop.permute.xlu0 %547 }
 0x43d   :  { %v550_v27 = vadd.f32 %v548_v26, %v2122_v50 }
 0x43f   :  { %1635 = vtanh.f32 %v550_v27  ;;  %v1570_v29 = vmul.f32 -1.442695, %v550_v27 }
 0x441   :  { %1637 = vpow2.f32 %v1570_v29 }
 0x445   :  { %v1636_v28 = vpop.eup %1635 }
 0x446   :  { %576 = vrot.lane.b32.xlu1 %v1636_v28, %s1755_s3 }
 0x447   :  { %v1638_v30 = vpop.eup %1637 }
 0x448   :  { %v554_v31 = vadd.f32 1.0, %v1638_v30 }
 0x44a   :  { %1639 = vrcp.f32 %v554_v31  ;;  %v566_v37 = vand.u32 2147483648, %v554_v31  ;;  %vm560_vm13 = vweird.f32 %v554_v31  ;;  %v564_v38 = vand.u32 2147483647, %v554_v31 }
 0x44c   :  { %v567_v40 = vor.u32 1.1754944e-38, %v566_v37  ;;  %vm565_vm15 = vcmp.eq.f32.partialorder %v564_v38, 8.507059e+37 }
 0x450   :  { %v1640_v32 = vpop.eup %1639 }
 0x451   :  { %v556_v33 = vmul.f32 %v1640_v32, %v554_v31  ;;  %vm561_vm12 = vweird.f32 %v1640_v32 }
 0x452   :  { %vm562_vm14 = vmor %vm560_vm13, %vm561_vm12 }
 0x453   :  { %v557_v34 = vsub.f32 1.0, %v556_v33 }
 0x455   :  { %v558_v35 = vmul.f32 %v1640_v32, %v557_v34 }
 0x457   :  { %v559_v36 = vadd.f32 %v1640_v32, %v558_v35 }
 0x459   :  { %v563_v39 = vsel %vm562_vm14, %v1640_v32, %v559_v36 }
 0x45a   :  { %v568_v42 = vsel %vm565_vm15, %v567_v40, %v563_v39 }
 0x45b   :  { %v574_v45 = vmul.f32 %v572_v44, %v568_v42 }
 0x4b8   :  { %v577_v41 = vpop.permute.xlu1 %576 }
 0x4b9   :  { %v579_v43 = vmul.f32 %v577_v41, %v568_v42 }
 0x4bb   :  { %581 = vrot.lane.b32.xlu2 %v579_v43, %s1754_s23 }
 0x515   :  { %v582_v46 = vpop.permute.xlu2 %581 }
 0x516   :  { %v584_v47 = vadd.f32 %v582_v46, %v574_v45 }
 0x518   :  { %1641 = vtanh.f32 %v584_v47  ;;  %v649_v14 = vrot.slane %v584_v47, 6 }
 0x51e   :  { %v1642_v48 = vpop.eup %1641 }
 0x51f   :  { %587 = vrot.lane.b32.xlu0 %v1642_v48, %s1754_s23 }
 0x591   :  { %v588_v49 = vpop.permute.xlu0 %587 }
 0x592   :  { %v2149_v51 = vmul.f32 %v588_v49, %v568_v42 }
 0x594   :  { %v597_v52 = vrot.slane %v2149_v51, 2 }
 0x596   :  { %598 = vrot.lane.b32.xlu1 %v597_v52, %s1755_s3 }
 0x608   :  { %v599_v53 = vpop.permute.xlu1 %598 }
 0x609   :  { %1572 = vmatmul.msk.f32.vlgmr.msra.gmra.mxu1 %vm435_vm3, %v599_v53 }
 0x60a   :  { %1589 = vmatpush.msk.msra.mxu1 %vm447_vm1, %v2069_v3 }
 0x60c   :  { %1071 = vmatpush.msra.mxu1 %v2078_v4 }
 0x686   :  { %v619_v54 = vpop.f32.mrf.mxu1 }
 0x687   :  { %v623_v57 = vrot.slane %v619_v54, 4 }
 0x689   :  { %624 = vrot.lane.b32.xlu2 %v623_v57, %s1754_s23 }
 0x6e3   :  { %v625_v58 = vpop.permute.xlu2 %624 }
 0x6e4   :  { %v627_v59 = vadd.f32 %v625_v58, %v2122_v50 }
 0x6e6   :  { %1643 = vtanh.f32 %v627_v59  ;;  %v1573_v61 = vmul.f32 -1.442695, %v627_v59 }
 0x6e8   :  { %1645 = vpow2.f32 %v1573_v61 }
 0x6ec   :  { %v1644_v60 = vpop.eup %1643 }
 0x6ed   :  { %653 = vrot.lane.b32.xlu0 %v1644_v60, %s1755_s3 }
 0x6ee   :  { %v1646_v62 = vpop.eup %1645 }
 0x6ef   :  { %v631_v63 = vadd.f32 1.0, %v1646_v62 }
 0x6f1   :  { %1647 = vrcp.f32 %v631_v63  ;;  %v643_v7 = vand.u32 2147483648, %v631_v63  ;;  %vm637_vm2 = vweird.f32 %v631_v63  ;;  %v641_v8 = vand.u32 2147483647, %v631_v63 }
 0x6f3   :  { %v644_v10 = vor.u32 1.1754944e-38, %v643_v7  ;;  %vm642_vm6 = vcmp.eq.f32.partialorder %v641_v8, 8.507059e+37 }
 0x6f7   :  { %v1648_v0 = vpop.eup %1647 }
 0x6f8   :  { %v633_v1 = vmul.f32 %v1648_v0, %v631_v63  ;;  %vm638_vm0 = vweird.f32 %v1648_v0 }
 0x6f9   :  { %vm639_vm5 = vmor %vm637_vm2, %vm638_vm0 }
 0x6fa   :  { %v634_v2 = vsub.f32 1.0, %v633_v1 }
 0x6fc   :  { %v635_v5 = vmul.f32 %v1648_v0, %v634_v2 }
 0x6fe   :  { %v636_v6 = vadd.f32 %v1648_v0, %v635_v5 }
 0x700   :  { %v640_v9 = vsel %vm639_vm5, %v1648_v0, %v636_v6 }
 0x701   :  { %v645_v12 = vsel %vm642_vm6, %v644_v10, %v640_v9 }
 0x702   :  { %v651_v15 = vmul.f32 %v649_v14, %v645_v12 }
 0x75f   :  { %v654_v11 = vpop.permute.xlu0 %653 }
 0x760   :  { %v656_v13 = vmul.f32 %v654_v11, %v645_v12 }
 0x762   :  { %658 = vrot.lane.b32.xlu1 %v656_v13, %s1754_s23 }
 0x7d4   :  { %v659_v16 = vpop.permute.xlu1 %658 }
 0x7d5   :  { %v661_v17 = vadd.f32 %v659_v16, %v651_v15 }
 0x7d7   :  { %1649 = vtanh.f32 %v661_v17  ;;  %v726_v40 = vrot.slane %v661_v17, 6 }
 0x7dd   :  { %v1650_v18 = vpop.eup %1649 }
 0x7de   :  { %664 = vrot.lane.b32.xlu2 %v1650_v18, %s1754_s23 }
 0x838   :  { %v665_v19 = vpop.permute.xlu2 %664 }
 0x839   :  { %v2162_v20 = vmul.f32 %v665_v19, %v645_v12 }
 0x83b   :  { %v674_v21 = vrot.slane %v2162_v20, 4 }
 0x83d   :  { %675 = vrot.lane.b32.xlu0 %v674_v21, %s1755_s3 }
 0x8af   :  { %v676_v22 = vpop.permute.xlu0 %675 }
 0x8b0   :  { %1575 = vmatmul.msk.f32.vlgmr.msrb.gmra.mxu3 %vm435_vm3, %v676_v22 }
 0x8b1   :  { %1595 = vmatpush.msk.msrb.mxu3 %vm447_vm1, %v2069_v3 }
 0x8b3   :  { %1219 = vmatpush.msrb.mxu3 %v2078_v4 }
 0x933   :  { %v696_v23 = vpop.f32.mrf.mxu3 }
 0x934   :  { %v700_v24 = vrot.slane %v696_v23, 2 }
 0x936   :  { %701 = vrot.lane.b32.xlu1 %v700_v24, %s1754_s23 }
 0x9a8   :  { %v702_v25 = vpop.permute.xlu1 %701 }
 0x9a9   :  { %v704_v26 = vadd.f32 %v702_v25, %v2122_v50 }
 0x9ab   :  { %1651 = vtanh.f32 %v704_v26  ;;  %v1576_v28 = vmul.f32 -1.442695, %v704_v26 }
 0x9ad   :  { %1653 = vpow2.f32 %v1576_v28 }
 0x9b1   :  { %v1652_v27 = vpop.eup %1651 }
 0x9b2   :  { %730 = vrot.lane.b32.xlu2 %v1652_v27, %s1755_s3 }
 0x9b3   :  { %v1654_v29 = vpop.eup %1653 }
 0x9b4   :  { %v708_v30 = vadd.f32 1.0, %v1654_v29 }
 0x9b6   :  { %1655 = vrcp.f32 %v708_v30  ;;  %v720_v34 = vand.u32 2147483648, %v708_v30  ;;  %vm714_vm7 = vweird.f32 %v708_v30  ;;  %v718_v35 = vand.u32 2147483647, %v708_v30 }
 0x9b8   :  { %v721_v36 = vor.u32 1.1754944e-38, %v720_v34  ;;  %vm719_vm9 = vcmp.eq.f32.partialorder %v718_v35, 8.507059e+37 }
 0x9bc   :  { %v1656_v31 = vpop.eup %1655 }
 0x9bd   :  { %v710_v3 = vmul.f32 %v1656_v31, %v708_v30  ;;  %vm715_vm1 = vweird.f32 %v1656_v31 }
 0x9be   :  { %vm716_vm8 = vmor %vm714_vm7, %vm715_vm1 }
 0x9bf   :  { %v711_v32 = vsub.f32 1.0, %v710_v3 }
 0x9c1   :  { %v712_v4 = vmul.f32 %v1656_v31, %v711_v32 }
 0x9c3   :  { %v713_v33 = vadd.f32 %v1656_v31, %v712_v4 }
 0x9c5   :  { %v717_v50 = vsel %vm716_vm8, %v1656_v31, %v713_v33 }
 0x9c6   :  { %v722_v38 = vsel %vm719_vm9, %v721_v36, %v717_v50 }
 0x9c7   :  { %v728_v41 = vmul.f32 %v726_v40, %v722_v38 }
 0xa0c   :  { %v731_v37 = vpop.permute.xlu2 %730 }
 0xa0d   :  { %v733_v39 = vmul.f32 %v731_v37, %v722_v38 }
 0xa0f   :  { %735 = vrot.lane.b32.xlu0 %v733_v39, %s1754_s23 }
 0xa81   :  { %v736_v42 = vpop.permute.xlu0 %735 }
 0xa82   :  { %v738_v43 = vadd.f32 %v736_v42, %v728_v41 }
 0xa84   :  { %1657 = vtanh.f32 %v738_v43  ;;  %v802_v10 = vrot.slane %v738_v43, 6 }
 0xa8a   :  { %v1658_v44 = vpop.eup %1657 }
 0xa8b   :  { %741 = vrot.lane.b32.xlu1 %v1658_v44, %s1754_s23 }
 0xafd   :  { %v742_v45 = vpop.permute.xlu1 %741 }
 0xafe   :  { %v2175_v46 = vmul.f32 %v742_v45, %v722_v38 }
 0xb00   :  { %v751_v47 = vrot.slane %v2175_v46, 6 }
 0xb02   :  { %752 = vrot.lane.b32.xlu2 %v751_v47, %s1755_s3 }
 0xb5c   :  { %v753_v48 = vpop.permute.xlu2 %752 }
 0xb5d   :  { %1578 = vmatmul.msk.f32.vlgmr.msrb.gmra.mxu1 %vm435_vm3, %v753_v48 }
 0xbda   :  { %v773_v49 = vpop.f32.mrf.mxu1 }
 0xbdb   :  { %777 = vrot.lane.b32.xlu0 %v773_v49, %s1754_s23 }
 0xc4d   :  { %v778_v52 = vpop.permute.xlu0 %777 }
 0xc4e   :  { %v780_v53 = vadd.f32 %v778_v52, %v2129_v56 }
 0xc50   :  { %1659 = vtanh.f32 %v780_v53  ;;  %v1579_v57 = vmul.f32 -1.442695, %v780_v53 }
 0xc52   :  { %1661 = vpow2.f32 %v1579_v57 }
 0xc56   :  { %v1660_v54 = vpop.eup %1659 }
 0xc57   :  { %806 = vrot.lane.b32.xlu1 %v1660_v54, %s1755_s3 }
 0xc58   :  { %v1662_v58 = vpop.eup %1661 }
 0xc59   :  { %v784_v59 = vadd.f32 1.0, %v1662_v58 }
 0xc5b   :  { %1663 = vrcp.f32 %v784_v59  ;;  %v796_v1 = vand.u32 2147483648, %v784_v59  ;;  %vm790_vm12 = vweird.f32 %v784_v59  ;;  %v794_v2 = vand.u32 2147483647, %v784_v59 }
 0xc5d   :  { %v797_v6 = vor.u32 1.1754944e-38, %v796_v1  ;;  %vm795_vm14 = vcmp.eq.f32.partialorder %v794_v2, 8.507059e+37 }
 0xc61   :  { %v1664_v60 = vpop.eup %1663 }
 0xc62   :  { %v786_v61 = vmul.f32 %v1664_v60, %v784_v59  ;;  %vm791_vm10 = vweird.f32 %v1664_v60 }
 0xc63   :  { %vm792_vm13 = vmor %vm790_vm12, %vm791_vm10 }
 0xc64   :  { %v787_v62 = vsub.f32 1.0, %v786_v61 }
 0xc66   :  { %v788_v63 = vmul.f32 %v1664_v60, %v787_v62 }
 0xc68   :  { %v789_v0 = vadd.f32 %v1664_v60, %v788_v63 }
 0xc6a   :  { %v793_v5 = vsel %vm792_vm13, %v1664_v60, %v789_v0 }
 0xc6b   :  { %v798_v8 = vsel %vm795_vm14, %v797_v6, %v793_v5 }
 0xc6c   :  { %v804_v11 = vmul.f32 %v802_v10, %v798_v8 }
 0xcc9   :  { %v807_v7 = vpop.permute.xlu1 %806 }
 0xcca   :  { %v809_v9 = vmul.f32 %v807_v7, %v798_v8 }
 0xccc   :  { %811 = vrot.lane.b32.xlu2 %v809_v9, %s1754_s23 }
 0xd26   :  { %v812_v12 = vpop.permute.xlu2 %811 }
 0xd27   :  { %v814_v13 = vadd.f32 %v812_v12, %v804_v11 }
 0xd29   :  { %1665 = vtanh.f32 %v814_v13  ;;  %v875_v36 = vrot.slane %v814_v13, 6 }
 0xd2f   :  { %v1666_v14 = vpop.eup %1665 }
 0xd30   :  { %817 = vrot.lane.b32.xlu0 %v1666_v14, %s1754_s23 }
 0xda2   :  { %v818_v15 = vpop.permute.xlu0 %817 }
 0xda3   :  { %v820_v16 = vmul.f32 %v818_v15, %v798_v8 }
 0xda5   :  { %822 = vrot.lane.b32.xlu1 %v820_v16, %s1755_s3 }
 0xe17   :  { %v823_v17 = vpop.permute.xlu1 %822 }
 0xe18   :  { %825 = vst.msk [vmem:[#allocation2 + $0x8] sm:$0x3] %vm521_vm11, %v823_v17  ;;  %1581 = vmatmul.msk.f32.vlgmr.msra.gmra.mxu2 %vm435_vm3, %v823_v17 }
 0xe9b   :  { %v845_v18 = vpop.f32.mrf.mxu2 }
 0xe9c   :  { %v849_v19 = vrot.slane %v845_v18, 6 }
 0xe9e   :  { %850 = vrot.lane.b32.xlu2 %v849_v19, %s1754_s23 }
 0xef8   :  { %v851_v21 = vpop.permute.xlu2 %850 }
 0xef9   :  { %v853_v22 = vadd.f32 %v851_v21, %v2129_v56 }
 0xefb   :  { %1667 = vtanh.f32 %v853_v22  ;;  %v1582_v24 = vmul.f32 -1.442695, %v853_v22 }
 0xefd   :  { %1669 = vpow2.f32 %v1582_v24 }
 0xf01   :  { %v1668_v23 = vpop.eup %1667 }
 0xf02   :  { %879 = vrot.lane.b32.xlu0 %v1668_v23, %s1755_s3 }
 0xf03   :  { %v1670_v25 = vpop.eup %1669 }
 0xf04   :  { %v857_v26 = vadd.f32 1.0, %v1670_v25 }
 0xf06   :  { %1671 = vrcp.f32 %v857_v26  ;;  %v869_v3 = vand.u32 2147483648, %v857_v26  ;;  %vm863_vm0 = vweird.f32 %v857_v26  ;;  %v867_v32 = vand.u32 2147483647, %v857_v26 }
 0xf08   :  { %v870_v33 = vor.u32 1.1754944e-38, %v869_v3  ;;  %vm868_vm5 = vcmp.eq.f32.partialorder %v867_v32, 8.507059e+37 }
 0xf0c   :  { %v1672_v27 = vpop.eup %1671 }
 0xf0d   :  { %v859_v28 = vmul.f32 %v1672_v27, %v857_v26  ;;  %vm864_vm15 = vweird.f32 %v1672_v27 }
 0xf0e   :  { %vm865_vm2 = vmor %vm863_vm0, %vm864_vm15 }
 0xf0f   :  { %v860_v29 = vsub.f32 1.0, %v859_v28 }
 0xf11   :  { %v861_v30 = vmul.f32 %v1672_v27, %v860_v29 }
 0xf13   :  { %v862_v31 = vadd.f32 %v1672_v27, %v861_v30 }
 0xf15   :  { %v866_v4 = vsel %vm865_vm2, %v1672_v27, %v862_v31 }
 0xf16   :  { %v871_v35 = vsel %vm868_vm5, %v870_v33, %v866_v4 }
 0xf17   :  { %v877_v37 = vmul.f32 %v875_v36, %v871_v35 }
 0xf74   :  { %v880_v34 = vpop.permute.xlu0 %879 }
 0xf75   :  { %v882_v50 = vmul.f32 %v880_v34, %v871_v35 }
 0xf77   :  { %884 = vrot.lane.b32.xlu1 %v882_v50, %s1754_s23 }
 0xfe9   :  { %v885_v38 = vpop.permute.xlu1 %884 }
 0xfea   :  { %v887_v39 = vadd.f32 %v885_v38, %v877_v37 }
 0xfec   :  { %1673 = vtanh.f32 %v887_v39  ;;  %v951_v8 = vrot.slane %v887_v39, 6 }
 0xff2   :  { %v1674_v40 = vpop.eup %1673 }
 0xff3   :  { %890 = vrot.lane.b32.xlu2 %v1674_v40, %s1754_s23 }
0x104d   :  { %v891_v41 = vpop.permute.xlu2 %890 }
0x104e   :  { %v2193_v42 = vmul.f32 %v891_v41, %v871_v35 }
0x1050   :  { %v899_v43 = vrot.slane %v2193_v42, 2 }
0x1052   :  { %900 = vrot.lane.b32.xlu0 %v899_v43, %s1755_s3 }
0x10c4   :  { %v901_v44 = vpop.permute.xlu0 %900 }
0x10c5   :  { %1584 = vmatmul.msk.f32.vlgmr.msra.gmra.mxu3 %vm435_vm3, %v901_v44 }
0x1148   :  { %v921_v45 = vpop.f32.mrf.mxu3 }
0x1149   :  { %v925_v47 = vrot.slane %v921_v45, 4 }
0x114b   :  { %926 = vrot.lane.b32.xlu1 %v925_v47, %s1754_s23 }
0x11bd   :  { %v927_v48 = vpop.permute.xlu1 %926 }
0x11be   :  { %v929_v49 = vadd.f32 %v927_v48, %v2129_v56 }
0x11c0   :  { %1675 = vtanh.f32 %v929_v49  ;;  %v1585_v53 = vmul.f32 -1.442695, %v929_v49 }
0x11c2   :  { %1677 = vpow2.f32 %v1585_v53 }
0x11c6   :  { %v1676_v52 = vpop.eup %1675 }
0x11c7   :  { %955 = vrot.lane.b32.xlu2 %v1676_v52, %s1755_s3 }
0x11c8   :  { %v1678_v54 = vpop.eup %1677 }
0x11c9   :  { %v933_v57 = vadd.f32 1.0, %v1678_v54 }
0x11cb   :  { %1679 = vrcp.f32 %v933_v57  ;;  %v945_v63 = vand.u32 2147483648, %v933_v57  ;;  %vm939_vm1 = vweird.f32 %v933_v57  ;;  %v943_v0 = vand.u32 2147483647, %v933_v57 }
0x11cd   :  { %v946_v2 = vor.u32 1.1754944e-38, %v945_v63  ;;  %vm944_vm8 = vcmp.eq.f32.partialorder %v943_v0, 8.507059e+37 }
0x11d1   :  { %v1680_v58 = vpop.eup %1679 }
0x11d2   :  { %v935_v59 = vmul.f32 %v1680_v58, %v933_v57  ;;  %vm940_vm6 = vweird.f32 %v1680_v58 }
0x11d3   :  { %vm941_vm7 = vmor %vm939_vm1, %vm940_vm6 }
0x11d4   :  { %v936_v60 = vsub.f32 1.0, %v935_v59 }
0x11d6   :  { %v937_v61 = vmul.f32 %v1680_v58, %v936_v60 }
0x11d8   :  { %v938_v62 = vadd.f32 %v1680_v58, %v937_v61 }
0x11da   :  { %v942_v1 = vsel %vm941_vm7, %v1680_v58, %v938_v62 }
0x11db   :  { %v947_v6 = vsel %vm944_vm8, %v946_v2, %v942_v1 }
0x11dc   :  { %v953_v9 = vmul.f32 %v951_v8, %v947_v6 }
0x1221   :  { %v956_v5 = vpop.permute.xlu2 %955 }
0x1222   :  { %v958_v7 = vmul.f32 %v956_v5, %v947_v6 }
0x1224   :  { %960 = vrot.lane.b32.xlu0 %v958_v7, %s1754_s23 }
0x1296   :  { %v961_v10 = vpop.permute.xlu0 %960 }
0x1297   :  { %v963_v11 = vadd.f32 %v961_v10, %v953_v9 }
0x1299   :  { %1681 = vtanh.f32 %v963_v11  ;;  %v1027_v35 = vrot.slane %v963_v11, 6 }
0x129f   :  { %v1682_v12 = vpop.eup %1681 }
0x12a0   :  { %966 = vrot.lane.b32.xlu1 %v1682_v12, %s1754_s23 }
0x1312   :  { %v967_v13 = vpop.permute.xlu1 %966 }
0x1313   :  { %v2203_v14 = vmul.f32 %v967_v13, %v947_v6 }
0x1315   :  { %v975_v15 = vrot.slane %v2203_v14, 4 }
0x1317   :  { %976 = vrot.lane.b32.xlu2 %v975_v15, %s1755_s3 }
0x1371   :  { %v977_v16 = vpop.permute.xlu2 %976 }
0x1372   :  { %1587 = vmatmul.msk.f32.vlgmr.msrb.gmra.mxu0 %vm435_vm3, %v977_v16 }
0x13ef   :  { %v997_v17 = vpop.f32.mrf.mxu0 }
0x13f0   :  { %v1001_v18 = vrot.slane %v997_v17, 2 }
0x13f2   :  { %1002 = vrot.lane.b32.xlu0 %v1001_v18, %s1754_s23 }
0x1464   :  { %v1003_v19 = vpop.permute.xlu0 %1002 }
0x1465   :  { %v1005_v21 = vadd.f32 %v1003_v19, %v2129_v56 }
0x1467   :  { %1683 = vtanh.f32 %v1005_v21  ;;  %v1588_v23 = vmul.f32 -1.442695, %v1005_v21 }
0x1469   :  { %1685 = vpow2.f32 %v1588_v23 }
0x146d   :  { %v1684_v22 = vpop.eup %1683 }
0x146e   :  { %1031 = vrot.lane.b32.xlu1 %v1684_v22, %s1755_s3 }
0x146f   :  { %v1686_v24 = vpop.eup %1685 }
0x1470   :  { %v1009_v25 = vadd.f32 1.0, %v1686_v24 }
0x1472   :  { %1687 = vrcp.f32 %v1009_v25  ;;  %v1021_v31 = vand.u32 2147483648, %v1009_v25  ;;  %vm1015_vm10 = vweird.f32 %v1009_v25  ;;  %v1019_v3 = vand.u32 2147483647, %v1009_v25 }
0x1474   :  { %v1022_v32 = vor.u32 1.1754944e-38, %v1021_v31  ;;  %vm1020_vm13 = vcmp.eq.f32.partialorder %v1019_v3, 8.507059e+37 }
0x1478   :  { %v1688_v26 = vpop.eup %1687 }
0x1479   :  { %v1011_v27 = vmul.f32 %v1688_v26, %v1009_v25  ;;  %vm1016_vm9 = vweird.f32 %v1688_v26 }
0x147a   :  { %vm1017_vm12 = vmor %vm1015_vm10, %vm1016_vm9 }
0x147b   :  { %v1012_v28 = vsub.f32 1.0, %v1011_v27 }
0x147d   :  { %v1013_v29 = vmul.f32 %v1688_v26, %v1012_v28 }
0x147f   :  { %v1014_v30 = vadd.f32 %v1688_v26, %v1013_v29 }
0x1481   :  { %v1018_v56 = vsel %vm1017_vm12, %v1688_v26, %v1014_v30  ;;  %vm595_vm12 = vcmask 76802  }
0x1482   :  { %v1023_v33 = vsel %vm1020_vm13, %v1022_v32, %v1018_v56  ;;  %vm672_vm13 = vcmask 78852  }
0x1483   :  { %v1029_v50 = vmul.f32 %v1027_v35, %v1023_v33 }
0x14e0   :  { %v1032_v4 = vpop.permute.xlu1 %1031 }
0x14e1   :  { %v1034_v34 = vmul.f32 %v1032_v4, %v1023_v33 }
0x14e3   :  { %1036 = vrot.lane.b32.xlu2 %v1034_v34, %s1754_s23 }
0x153d   :  { %v1037_v36 = vpop.permute.xlu2 %1036 }
0x153e   :  { %v1039_v37 = vadd.f32 %v1037_v36, %v1029_v50 }
0x1540   :  { %1689 = vtanh.f32 %v1039_v37  ;;  %v1102_v6 = vrot.slane %v1039_v37, 6 }
0x1546   :  { %v1690_v38 = vpop.eup %1689 }
0x1547   :  { %1042 = vrot.lane.b32.xlu0 %v1690_v38, %s1754_s23 }
0x15b9   :  { %v1043_v39 = vpop.permute.xlu0 %1042 }
0x15ba   :  { %v2213_v40 = vmul.f32 %v1043_v39, %v1023_v33 }
0x15bc   :  { %v1051_v41 = vrot.slane %v2213_v40, 6 }
0x15be   :  { %1052 = vrot.lane.b32.xlu1 %v1051_v41, %s1755_s3 }
0x1630   :  { %v1053_v43 = vpop.permute.xlu1 %1052 }
0x1631   :  { %1590 = vmatmul.msk.f32.vlgmr.msra.gmra.mxu1 %vm435_vm3, %v1053_v43 }
0x16ae   :  { %v1073_v44 = vpop.f32.mrf.mxu1 }
0x16af   :  { %1077 = vrot.lane.b32.xlu2 %v1073_v44, %s1754_s23 }
0x1709   :  { %v1078_v45 = vpop.permute.xlu2 %1077 }
0x170a   :  { %v1080_v47 = vadd.f32 %v1078_v45, %v2127_v55 }
0x170c   :  { %1691 = vtanh.f32 %v1080_v47  ;;  %v1591_v49 = vmul.f32 -1.442695, %v1080_v47 }
0x170e   :  { %1693 = vpow2.f32 %v1591_v49 }
0x1712   :  { %v1692_v48 = vpop.eup %1691 }
0x1713   :  { %1106 = vrot.lane.b32.xlu0 %v1692_v48, %s1755_s3 }
0x1714   :  { %v1694_v52 = vpop.eup %1693 }
0x1715   :  { %v1084_v53 = vadd.f32 1.0, %v1694_v52 }
0x1717   :  { %1695 = vrcp.f32 %v1084_v53  ;;  %v1096_v61 = vand.u32 2147483648, %v1084_v53  ;;  %vm1090_vm15 = vweird.f32 %v1084_v53  ;;  %v1094_v62 = vand.u32 2147483647, %v1084_v53 }
0x1719   :  { %v1097_v0 = vor.u32 1.1754944e-38, %v1096_v61  ;;  %vm1095_vm2 = vcmp.eq.f32.partialorder %v1094_v62, 8.507059e+37 }
0x171d   :  { %v1696_v54 = vpop.eup %1695 }
0x171e   :  { %v1086_v57 = vmul.f32 %v1696_v54, %v1084_v53  ;;  %vm1091_vm14 = vweird.f32 %v1696_v54 }
0x171f   :  { %vm1092_vm0 = vmor %vm1090_vm15, %vm1091_vm14  ;;  %vm749_vm14 = vcmask 80902   ;;  %vm1302_vm15 = vcmask 359424  }
0x1720   :  { %v1087_v58 = vsub.f32 1.0, %v1086_v57 }
0x1722   :  { %v1088_v59 = vmul.f32 %v1696_v54, %v1087_v58 }
0x1724   :  { %v1089_v60 = vadd.f32 %v1696_v54, %v1088_v59 }
0x1726   :  { %v1093_v63 = vsel %vm1092_vm0, %v1696_v54, %v1089_v60 }
0x1727   :  { %v1098_v2 = vsel %vm1095_vm2, %v1097_v0, %v1093_v63 }
0x1728   :  { %v1104_v7 = vmul.f32 %v1102_v6, %v1098_v2 }
0x1785   :  { %v1107_v1 = vpop.permute.xlu0 %1106 }
0x1786   :  { %v1109_v5 = vmul.f32 %v1107_v1, %v1098_v2 }
0x1788   :  { %1111 = vrot.lane.b32.xlu1 %v1109_v5, %s1754_s23 }
0x17fa   :  { %v1112_v8 = vpop.permute.xlu1 %1111 }
0x17fb   :  { %v1114_v9 = vadd.f32 %v1112_v8, %v1104_v7 }
0x17fd   :  { %1697 = vtanh.f32 %v1114_v9  ;;  %v1175_v33 = vrot.slane %v1114_v9, 6 }
0x1803   :  { %v1698_v10 = vpop.eup %1697 }
0x1804   :  { %1117 = vrot.lane.b32.xlu2 %v1698_v10, %s1754_s23 }
0x185e   :  { %v1118_v11 = vpop.permute.xlu2 %1117 }
0x185f   :  { %v1120_v12 = vmul.f32 %v1118_v11, %v1098_v2 }
0x1861   :  { %1122 = vrot.lane.b32.xlu0 %v1120_v12, %s1755_s3 }
0x18d3   :  { %v1123_v13 = vpop.permute.xlu0 %1122 }
0x18d4   :  { %1125 = vst.msk [vmem:[#allocation2 + $0x10] sm:$0x3] %vm521_vm11, %v1123_v13  ;;  %1593 = vmatmul.msk.f32.vlgmr.msrb.gmra.mxu2 %vm435_vm3, %v1123_v13 }
0x1957   :  { %v1145_v15 = vpop.f32.mrf.mxu2 }
0x1958   :  { %v1149_v16 = vrot.slane %v1145_v15, 6 }
0x195a   :  { %1150 = vrot.lane.b32.xlu1 %v1149_v16, %s1754_s23  ;;  %v1756_v16 = vmov 0  }
0x195b   :  { %1622 = vset.pattern.permute.xlu0 %v1756_v16  ;;  %1623 = vset.pattern.permute.xlu1 %v1756_v16 }
0x195c   :  { %1624 = vset.pattern.permute.xlu2 %v1756_v16  ;;  %v1468_v16 = vld [vmem:[%s2368_s14 + $0x58] sm:$0xff] }
0x19cc   :  { %v1151_v17 = vpop.permute.xlu1 %1150 }
0x19cd   :  { %v1153_v18 = vadd.f32 %v1151_v17, %v2127_v55  ;;  %v1285_v17 = vld [vmem:[%s2367_s13 + $0x8] sm:$0xff] }
0x19cf   :  { %1699 = vtanh.f32 %v1153_v18  ;;  %v1594_v21 = vmul.f32 -1.442695, %v1153_v18 }
0x19d1   :  { %1701 = vpow2.f32 %v1594_v21 }
0x19d5   :  { %v1700_v19 = vpop.eup %1699 }
0x19d6   :  { %1179 = vrot.lane.b32.xlu2 %v1700_v19, %s1755_s3 }
0x19d7   :  { %v1702_v22 = vpop.eup %1701 }
0x19d8   :  { %v1157_v23 = vadd.f32 1.0, %v1702_v22  ;;  %v1281_v22 = vld [vmem:[%s2366_s12] sm:$0xff] }
0x19da   :  { %1703 = vrcp.f32 %v1157_v23  ;;  %v1169_v29 = vand.u32 2147483648, %v1157_v23  ;;  %vm1163_vm6 = vweird.f32 %v1157_v23  ;;  %v1167_v30 = vand.u32 2147483647, %v1157_v23 }
0x19dc   :  { %v1170_v3 = vor.u32 1.1754944e-38, %v1169_v29  ;;  %vm1168_vm7 = vcmp.eq.f32.partialorder %v1167_v30, 8.507059e+37 }
0x19e0   :  { %v1704_v24 = vpop.eup %1703 }
0x19e1   :  { %v1159_v25 = vmul.f32 %v1704_v24, %v1157_v23  ;;  %vm1164_vm5 = vweird.f32 %v1704_v24 }
0x19e2   :  { %vm1165_vm1 = vmor %vm1163_vm6, %vm1164_vm5 }
0x19e3   :  { %v1160_v26 = vsub.f32 1.0, %v1159_v25  ;;  %v1283_v25 = vld [vmem:[%s2366_s12 + $0x10] sm:$0x3f] }
0x19e5   :  { %v1161_v27 = vmul.f32 %v1704_v24, %v1160_v26 }
0x19e7   :  { %v1162_v28 = vadd.f32 %v1704_v24, %v1161_v27 }
0x19e9   :  { %v1166_v31 = vsel %vm1165_vm1, %v1704_v24, %v1162_v28  ;;  %v1282_v24 = vld [vmem:[%s2366_s12 + $0x8] sm:$0xff]  ;;  %s1757_s12 = smov 30  }
0x19ea   :  { %v1171_v32 = vsel %vm1168_vm7, %v1170_v3, %v1166_v31 }
0x19eb   :  { %v1177_v34 = vmul.f32 %v1175_v33, %v1171_v32 }
0x1a30   :  { %v1180_v56 = vpop.permute.xlu2 %1179 }
0x1a31   :  { %v1182_v4 = vmul.f32 %v1180_v56, %v1171_v32 }
0x1a33   :  { %1184 = vrot.lane.b32.xlu0 %v1182_v4, %s1754_s23 }
0x1aa5   :  { %v1185_v35 = vpop.permute.xlu0 %1184 }
0x1aa6   :  { %v1187_v50 = vadd.f32 %v1185_v35, %v1177_v34 }
0x1aa8   :  { %1705 = vtanh.f32 %v1187_v50  ;;  %v1251_v6 = vrot.slane %v1187_v50, 6 }
0x1aae   :  { %v1706_v36 = vpop.eup %1705 }
0x1aaf   :  { %1190 = vrot.lane.b32.xlu1 %v1706_v36, %s1754_s23 }
0x1b21   :  { %v1191_v37 = vpop.permute.xlu1 %1190 }
0x1b22   :  { %v1193_v38 = vmul.f32 %v1191_v37, %v1171_v32 }
0x1b24   :  { %v1199_v39 = vrot.slane %v1193_v38, 2 }
0x1b26   :  { %1200 = vrot.lane.b32.xlu2 %v1199_v39, %s1755_s3 }
0x1b80   :  { %v1201_v41 = vpop.permute.xlu2 %1200 }
0x1b81   :  { %1596 = vmatmul.msk.f32.vlgmr.msrb.gmra.mxu3 %vm435_vm3, %v1201_v41 }
0x1c04   :  { %v1221_v43 = vpop.f32.mrf.mxu3 }
0x1c05   :  { %v1225_v44 = vrot.slane %v1221_v43, 4 }
0x1c07   :  { %1226 = vrot.lane.b32.xlu0 %v1225_v44, %s1754_s23 }
0x1c79   :  { %v1227_v45 = vpop.permute.xlu0 %1226 }
0x1c7a   :  { %v1229_v47 = vadd.f32 %v1227_v45, %v2127_v55 }
0x1c7c   :  { %1707 = vtanh.f32 %v1229_v47  ;;  %v1597_v49 = vmul.f32 -1.442695, %v1229_v47 }
0x1c7e   :  { %1709 = vpow2.f32 %v1597_v49 }
0x1c82   :  { %v1708_v48 = vpop.eup %1707 }
0x1c83   :  { %1255 = vrot.lane.b32.xlu1 %v1708_v48, %s1755_s3 }
0x1c84   :  { %v1710_v52 = vpop.eup %1709 }
0x1c85   :  { %v1233_v53 = vadd.f32 1.0, %v1710_v52 }
0x1c87   :  { %1711 = vrcp.f32 %v1233_v53  ;;  %v1245_v60 = vand.u32 2147483648, %v1233_v53  ;;  %vm1239_vm8 = vweird.f32 %v1233_v53  ;;  %v1243_v61 = vand.u32 2147483647, %v1233_v53 }
0x1c89   :  { %vm1244_vm10 = vcmp.eq.f32.partialorder %v1243_v61, 8.507059e+37 }
0x1c8b   :  { %1195 = vrot.lane.b32.xlu1 %v1193_v38, %s1755_s3 }
0x1c8d   :  { %v1712_v54 = vpop.eup %1711 }
0x1c8e   :  { %v1235_v57 = vmul.f32 %v1712_v54, %v1233_v53  ;;  %vm1240_vm3 = vweird.f32 %v1712_v54 }
0x1c8f   :  { %vm1241_vm9 = vmor %vm1239_vm8, %vm1240_vm3 }
0x1c90   :  { %v1236_v55 = vsub.f32 1.0, %v1235_v57 }
0x1c92   :  { %v1237_v58 = vmul.f32 %v1712_v54, %v1236_v55 }
0x1c93   :  { %971 = vrot.lane.b32.xlu1 %v2203_v14, %s1755_s3  ;;  %v1246_v14 = vor.u32 1.1754944e-38, %v1245_v60 }
0x1c94   :  { %v1238_v59 = vadd.f32 %v1712_v54, %v1237_v58 }
0x1c96   :  { %v1242_v62 = vsel %vm1241_vm9, %v1712_v54, %v1238_v59 }
0x1c9b   :  { %669 = vrot.lane.b32.xlu1 %v2162_v20, %s1755_s3  ;;  %v1247_v20 = vsel %vm1244_vm10, %v1246_v14, %v1242_v62 }
0x1c9c   :  { %v1253_v7 = vmul.f32 %v1251_v6, %v1247_v20 }
0x1ca3   :  { %1294 = vperm.xlu1 %1623, %v1285_v17   ;;  %v1466_v17 = vld [vmem:[%s2368_s14 + $0x48] sm:$0xff] }
0x1cf5   :  { %v1256_v63 = vpop.permute.xlu1 %1255 }
0x1cf6   :  { %v1258_v0 = vmul.f32 %v1256_v63, %v1247_v20 }
0x1cf8   :  { %1260 = vrot.lane.b32.xlu2 %v1258_v0, %s1754_s23 }
0x1cfd   :  { %v1196_v1 = vpop.permute.xlu1 %1195 }
0x1cfe   :  { %1198 = vst.msk [vmem:[#allocation2 + $0x10] sm:$0xc] %vm595_vm12, %v1196_v1 }
0x1d00   :  { %1047 = vrot.lane.b32.xlu2 %v2213_v40, %s1755_s3 }
0x1d05   :  { %v972_v2 = vpop.permute.xlu1 %971 }
0x1d06   :  { %974 = vst.msk [vmem:[#allocation2 + $0x8] sm:$0x30] %vm672_vm13, %v972_v2 }
0x1d0d   :  { %v670_v5 = vpop.permute.xlu1 %669 }
0x1d0e   :  { %673 = vst.msk [vmem:[#allocation2] sm:$0x30] %vm672_vm13, %v670_v5 }
0x1d15   :  { %v1295_v30 = vpop.permute.xlu1 %1294 }
0x1d52   :  { %v1261_v8 = vpop.permute.xlu2 %1260 }
0x1d53   :  { %v1263_v9 = vadd.f32 %v1261_v8, %v1253_v7 }
0x1d55   :  { %1713 = vtanh.f32 %v1263_v9 }
0x1d5a   :  { %v1048_v10 = vpop.permute.xlu2 %1047 }
0x1d5b   :  { %v1714_v11 = vpop.eup %1713  ;;  %1050 = vst.msk [vmem:[#allocation2 + $0x8] sm:$0xc0] %vm749_vm14, %v1048_v10 }
0x1d5c   :  { %1266 = vrot.lane.b32.xlu0 %v1714_v11, %s1754_s23 }
0x1d64   :  { %895 = vrot.lane.b32.xlu0 %v2193_v42, %s1755_s3  ;;  %v1284_v42 = vld [vmem:[%s2367_s13] sm:$0xff] }
0x1d6c   :  { %592 = vrot.lane.b32.xlu0 %v2149_v51, %s1755_s3 }
0x1d74   :  { %1289 = vperm.xlu0 %1622, %v1284_v42   ;;  %v1469_v42 = vld [vmem:[%s2368_s14 + $0x60] sm:$0xff] }
0x1dce   :  { %v1267_v40 = vpop.permute.xlu0 %1266 }
0x1dcf   :  { %v1269_v12 = vmul.f32 %v1267_v40, %v1247_v20 }
0x1dd1   :  { %1271 = vrot.lane.b32.xlu2 %v1269_v12, %s1755_s3 }
0x1dd6   :  { %v896_v13 = vpop.permute.xlu0 %895 }
0x1dd7   :  { %898 = vst.msk [vmem:[#allocation2 + $0x8] sm:$0xc] %vm595_vm12, %v896_v13 }
0x1dd9   :  { %746 = vrot.lane.b32.xlu2 %v2175_v46, %s1755_s3  ;;  %v1286_v46 = vld [vmem:[%s2367_s13 + $0x10] sm:$0x3f] }
0x1dde   :  { %v593_v15 = vpop.permute.xlu0 %592  ;;  %v2272_v21 = vld [vmem:[#allocation2 + $0x8] sm:$0xff] }
0x1ddf   :  { %596 = vst.msk [vmem:[#allocation2] sm:$0xc] %vm595_vm12, %v593_v15  ;;  %v1470_v15 = vld [vmem:[%s2368_s14 + $0x68] sm:$0x3f] }
0x1de0   :  { %1607 = vmatpush.msk.msra.mxu2 %vm420_vm4, %v1470_v15 }
0x1de1   :  { %1299 = vperm.xlu2 %1624, %v1286_v46   ;;  %v1465_v46 = vld [vmem:[%s2368_s14 + $0x40] sm:$0xff] }
0x1de2   :  { %1513 = vmatpush.msra.mxu2 %v1469_v42 }
0x1de4   :  { %1514 = vmatpush.msra.mxu2 %v1468_v16 }
0x1de6   :  { %v1290_v26 = vpop.permute.xlu0 %1289 }
0x1e2b   :  { %v1272_v51 = vpop.permute.xlu2 %1271 }
0x1e2c   :  { %1274 = vst.msk [vmem:[#allocation2 + $0x10] sm:$0x30] %vm672_vm13, %v1272_v51  ;;  %v1467_v51 = vld [vmem:[%s2368_s14 + $0x50] sm:$0xff]  ;;  %vm1407_vm13 = vcmask 158802  }
0x1e2d   :  { %1515 = vmatpush.msra.mxu2 %v1467_v51 }
0x1e2f   :  { %1516 = vmatpush.msra.mxu2 %v1466_v17 }
0x1e31   :  { %1517 = vmatpush.msra.mxu2 %v1465_v46 }
0x1e33   :  { %v747_v18 = vpop.permute.xlu2 %746  ;;  %v2268_v19 = vld [vmem:[#allocation2 + $0x10] sm:$0xff] }
0x1e34   :  { %750 = vst.msk [vmem:[#allocation2] sm:$0xc0] %vm749_vm14, %v747_v18  ;;  %1329 = vmatpush.msra.mxu0 %v2268_v19  ;;  %v1464_v18 = vld [vmem:[%s2368_s14 + $0x38] sm:$0xff]  ;;  %vm1412_vm14 = vcmask 242852  }
0x1e35   :  { %1518 = vmatpush.msra.mxu2 %v1464_v18 }
0x1e36   :  { %1330 = vmatpush.msra.mxu0 %v2272_v21 }
0x1e3b   :  { %v1275_v23 = vld [vmem:[#allocation2] sm:$0xff]  ;;  %v1300_v33 = vpop.permute.xlu2 %1299 }
0x1e3c   :  { %1331 = vmatpush.msra.mxu0 %v1275_v23 }
0x1e3d   :  { %1599 = vmatmul.msk.f32.vlgmr.msra.gmra.mxu0 %vm1302_vm15, %v1281_v22  ;;  %v1461_v22 = vld [vmem:[%s2368_s14 + $0x20] sm:$0xff] }
0x1e45   :  { %1600 = vmatmul.msk.f32.gmra.mxu0 %vm1302_vm15, %v1282_v24  ;;  %v1459_v24 = vld [vmem:[%s2368_s14 + $0x10] sm:$0xff] }
0x1e4d   :  { %1601 = vmatmul.msk.f32.gmra.mxu0 %vm1302_vm15, %v1283_v25  ;;  %v1475_v25 = vld [vmem:[%s2369_s15 + $0x18] sm:$0x3f]  ;;  %vm1417_vm15 = vcmask 326902  }
0x1e4e   :  { %1605 = vmatpush.msk.msrb.mxu1 %vm420_vm4, %v1475_v25  ;;  %vm1476_vm4 = vcmask 244736  }
0x1eba   :  { %v1333_v27 = vpop.f32.mrf.mxu0 }
0x1ebb   :  { %v1334_v28 = vadd.f32 %v1333_v27, %v1290_v26  ;;  %v1474_v26 = vld [vmem:[%s2369_s15 + $0x10] sm:$0xff]  ;;  %v1458_v27 = vld [vmem:[%s2368_s14 + $0x8] sm:$0xff] }
0x1ebc   :  { %1496 = vmatpush.msrb.mxu1 %v1474_v26 }
0x1ebd   :  { %v1602_v29 = vmul.f32 -1.442695, %v1334_v28 }
0x1ebf   :  { %1715 = vpow2.f32 %v1602_v29  ;;  %v1457_v29 = vld [vmem:[%s2368_s14] sm:$0xff] }
0x1ec2   :  { %v1336_v31 = vpop.f32.mrf.mxu0 }
0x1ec3   :  { %v1337_v3 = vadd.f32 %v1336_v31, %v1295_v30 }
0x1ec5   :  { %v1716_v56 = vpop.eup %1715  ;;  %v1603_v32 = vmul.f32 -1.442695, %v1337_v3  ;;  %v1473_v3 = vld [vmem:[%s2369_s15 + $0x8] sm:$0xff] }
0x1ec6   :  { %v1351_v4 = vadd.f32 1.0, %v1716_v56  ;;  %v1472_v56 = vld [vmem:[%s2369_s15] sm:$0xff]  ;;  %1497 = vmatpush.msrb.mxu1 %v1473_v3 }
0x1ec7   :  { %1717 = vpow2.f32 %v1603_v32  ;;  %v1471_v32 = vld [vmem:[%s2358_s4] sm:$0x3] }
0x1ec8   :  { %1719 = vrcp.f32 %v1351_v4  ;;  %v1365_v43 = vand.u32 2147483648, %v1351_v4  ;;  %v1363_v45 = vand.u32 2147483647, %v1351_v4  ;;  %vm1359_vm2 = vweird.f32 %v1351_v4  ;;  %1498 = vmatpush.msrb.mxu1 %v1472_v56 }
0x1ec9   :  { %1606 = vmatmul.msk.f32.vlgmr.msrb.gmra.mxu1 %vm1476_vm4, %v1471_v32 }
0x1eca   :  { %v1339_v34 = vpop.f32.mrf.mxu0  ;;  %v1366_v53 = vor.u32 1.1754944e-38, %v1365_v43  ;;  %vm1364_vm6 = vcmp.eq.f32.partialorder %v1363_v45, 8.507059e+37 }
0x1ecb   :  { %v1340_v35 = vadd.f32 %v1339_v34, %v1300_v33 }
0x1ecd   :  { %v1718_v50 = vpop.eup %1717  ;;  %v1604_v36 = vmul.f32 -1.442695, %v1340_v35 }
0x1ece   :  { %v1720_v37 = vpop.eup %1719  ;;  %v1352_v38 = vadd.f32 1.0, %v1718_v50 }
0x1ecf   :  { %v1355_v39 = vmul.f32 %v1720_v37, %v1351_v4  ;;  %1721 = vpow2.f32 %v1604_v36  ;;  %vm1360_vm0 = vweird.f32 %v1720_v37 }
0x1ed0   :  { %1723 = vrcp.f32 %v1352_v38  ;;  %vm1361_vm5 = vmor %vm1359_vm2, %vm1360_vm0  ;;  %v1380_v60 = vand.u32 2147483648, %v1352_v38  ;;  %v1378_v62 = vand.u32 2147483647, %v1352_v38  ;;  %vm1374_vm7 = vweird.f32 %v1352_v38 }
0x1ed1   :  { %v1356_v41 = vsub.f32 1.0, %v1355_v39  ;;  %vm1423_vm0 = vcmask 402752   ;;  %vm1428_vm2 = vcmask 486802  }
0x1ed2   :  { %v1381_v20 = vor.u32 1.1754944e-38, %v1380_v60  ;;  %vm1379_vm8 = vcmp.eq.f32.partialorder %v1378_v62, 8.507059e+37 }
0x1ed3   :  { %v1357_v44 = vmul.f32 %v1720_v37, %v1356_v41  ;;  %v1626_v41 = vld [vmem:[%s2370_s16] ss:$0 sm:$0xff] }
0x1ed5   :  { %v1722_v47 = vpop.eup %1721  ;;  %v1358_v48 = vadd.f32 %v1720_v37, %v1357_v44 }
0x1ed6   :  { %v1724_v49 = vpop.eup %1723  ;;  %v1353_v52 = vadd.f32 1.0, %v1722_v47 }
0x1ed7   :  { %v1370_v54 = vmul.f32 %v1724_v49, %v1352_v38  ;;  %v1362_v57 = vsel %vm1361_vm5, %v1720_v37, %v1358_v48  ;;  %vm1375_vm1 = vweird.f32 %v1724_v49  ;;  %vm1433_vm5 = vcmask 570852  }
0x1ed8   :  { %1725 = vrcp.f32 %v1353_v52  ;;  %v1367_v55 = vsel %vm1364_vm6, %v1366_v53, %v1362_v57  ;;  %vm1376_vm3 = vmor %vm1374_vm7, %vm1375_vm1  ;;  %v1395_v7 = vand.u32 2147483648, %v1353_v52  ;;  %v1393_v9 = vand.u32 2147483647, %v1353_v52 }
0x1ed9   :  { %v1371_v58 = vsub.f32 1.0, %v1370_v54  ;;  %v1399_v59 = vmul.f32 %v1367_v55, %v1275_v23  ;;  %v1460_v23 = vld [vmem:[%s2368_s14 + $0x18] sm:$0xff]  ;;  %vm1438_vm6 = vcmask 654902   ;;  %vm1444_vm1 = vcmask 730752  }
0x1eda   :  { %v1396_v11 = vor.u32 1.1754944e-38, %v1395_v7  ;;  %vm1394_vm12 = vcmp.eq.f32.partialorder %v1393_v9, 8.507059e+37  ;;  %vm1449_vm7 = vcmask 814802  }
0x1edb   :  { %1414 = vrot.lane.b32.xlu0 %v1399_v59, %s1757_s12  ;;  %1402 = vst.msk [vmem:[#allocation3] sm:$0x3] %vm521_vm11, %v1399_v59  ;;  %1409 = vrot.lane.b32.xlu2 %v1399_v59, %s1753_s20  ;;  %v1372_v61 = vmul.f32 %v1724_v49, %v1371_v58  ;;  %vm1389_vm11 = vweird.f32 %v1353_v52 }
0x1edc   :  { %1404 = vrot.lane.b32.xlu1 %v1399_v59, %s1754_s23 }
0x1edd   :  { %v1373_v14 = vadd.f32 %v1724_v49, %v1372_v61 }
0x1ede   :  { %v1726_v63 = vpop.eup %1725 }
0x1edf   :  { %v1385_v0 = vmul.f32 %v1726_v63, %v1353_v52  ;;  %v1377_v1 = vsel %vm1376_vm3, %v1724_v49, %v1373_v14  ;;  %vm1390_vm9 = vweird.f32 %v1726_v63  ;;  %vm1454_vm3 = vcmask 898852  }
0x1ee0   :  { %v1382_v2 = vsel %vm1379_vm8, %v1381_v20, %v1377_v1  ;;  %vm1391_vm10 = vmor %vm1389_vm11, %vm1390_vm9  ;;  %vm1503_vm8 = vcmask 900096   ;;  %vm1535_vm11 = vcmask 25600  }
0x1ee1   :  { %v1400_v5 = vmul.f32 %v1382_v2, %v2272_v21  ;;  %v1386_v6 = vsub.f32 1.0, %v1385_v0  ;;  %v1462_v21 = vld [vmem:[%s2368_s14 + $0x28] sm:$0xff] }
0x1ee3   :  { %1430 = vrot.lane.b32.xlu0 %v1400_v5, %s1758_s9  ;;  %1425 = vrot.lane.b32.xlu2 %v1400_v5, %s1759_s21  ;;  %v1387_v8 = vmul.f32 %v1726_v63, %v1386_v6 }
0x1ee4   :  { %1420 = vrot.lane.b32.xlu1 %v1400_v5, %s1760_s11 }
0x1ee5   :  { %v1388_v10 = vadd.f32 %v1726_v63, %v1387_v8 }
0x1ee7   :  { %v1392_v40 = vsel %vm1391_vm10, %v1726_v63, %v1388_v10 }
0x1ee8   :  { %v1397_v12 = vsel %vm1394_vm12, %v1396_v11, %v1392_v40 }
0x1ee9   :  { %v1401_v13 = vmul.f32 %v1397_v12, %v2268_v19  ;;  %v1463_v19 = vld [vmem:[%s2368_s14 + $0x30] sm:$0xff] }
0x1eea   :  { %1519 = vmatpush.msra.mxu2 %v1463_v19 }
0x1eeb   :  { %1446 = vrot.lane.b32.xlu0 %v1401_v13, %s1761_s22  ;;  %1441 = vrot.lane.b32.xlu2 %v1401_v13, %s1762_s6 }
0x1eec   :  { %1435 = vrot.lane.b32.xlu1 %v1400_v5, %s1763_s8  ;;  %1520 = vmatpush.msra.mxu2 %v1462_v21 }
0x1eee   :  { %1521 = vmatpush.msra.mxu2 %v1461_v22 }
0x1ef0   :  { %1522 = vmatpush.msra.mxu2 %v1460_v23 }
0x1ef2   :  { %1523 = vmatpush.msra.mxu2 %v1459_v24 }
0x1ef4   :  { %1451 = vrot.lane.b32.xlu1 %v1401_v13, %s1764_s2  ;;  %1524 = vmatpush.msra.mxu2 %v1458_v27 }
0x1ef6   :  { %1525 = vmatpush.msra.mxu2 %v1457_v29 }
0x1f35   :  { %v1410_v28 = vpop.permute.xlu2 %1409 }
0x1f3d   :  { %v1426_v4 = vpop.permute.xlu2 %1425 }
0x1f45   :  { %v1442_v50 = vpop.permute.xlu2 %1441 }
0x1f46   :  { %v1500_v39 = vpop.f32.mrf.mxu1 }
0x1f4d   :  { %v1415_v30 = vpop.permute.xlu0 %1414 }
0x1f4e   :  { %v1405_v31 = vpop.permute.xlu1 %1404 }
0x1f4f   :  { %1408 = vst.msk [vmem:[#allocation3 - $0x2] sm:$0xc] %vm1407_vm13, %v1405_v31 }
0x1f50   :  { %1413 = vst.msk [vmem:[#allocation3 - $0x4] sm:$0x30] %vm1412_vm14, %v1410_v28 }
0x1f51   :  { %1418 = vst.msk [vmem:[#allocation3 - $0x6] sm:$0xc0] %vm1417_vm15, %v1415_v30 }
0x1f55   :  { %v1431_v33 = vpop.permute.xlu0 %1430 }
0x1f56   :  { %v1421_v34 = vpop.permute.xlu1 %1420 }
0x1f57   :  { %1424 = vst.msk [vmem:[#allocation3] sm:$0x3] %vm1423_vm0, %v1421_v34 }
0x1f58   :  { %1429 = vst.msk [vmem:[#allocation3 - $0x2] sm:$0xc] %vm1428_vm2, %v1426_v4 }
0x1f59   :  { %1434 = vst.msk [vmem:[#allocation3 - $0x4] sm:$0x30] %vm1433_vm5, %v1431_v33 }
0x1f5d   :  { %v1447_v36 = vpop.permute.xlu0 %1446 }
0x1f5e   :  { %v1436_v35 = vpop.permute.xlu1 %1435 }
0x1f5f   :  { %1439 = vst.msk [vmem:[#allocation3 - $0x6] sm:$0xc0] %vm1438_vm6, %v1436_v35 }
0x1f60   :  { %1445 = vst.msk [vmem:[#allocation3] sm:$0x3] %vm1444_vm1, %v1442_v50 }
0x1f61   :  { %1450 = vst.msk [vmem:[#allocation3 - $0x2] sm:$0xc] %vm1449_vm7, %v1447_v36 }
0x1f66   :  { %v1452_v37 = vpop.permute.xlu1 %1451 }
0x1f67   :  { %1455 = vst.msk [vmem:[#allocation3 - $0x4] sm:$0x30] %vm1454_vm3, %v1452_v37 }
0x1f6e   :  { %v1456_v38 = vld [vmem:[#allocation3] sm:$0x3] }
0x1f6f   :  { %1608 = vmatmul.msk.f32.vlgmr.msra.gmra.mxu2 %vm1503_vm8, %v1456_v38 }
0x1ff2   :  { %v1527_v43 = vpop.f32.mrf.mxu2 }
0x1ff3   :  { %v1528_v44 = vadd.f32 %v1527_v43, %v1500_v39 }
0x1ff5   :  { %v1534_v45 = vadd.f32 %v1626_v41, %v1528_v44 }
0x1ff7   :  { %1536 = vst.msk [vmem:[#allocation4] sm:$0x3] %vm1535_vm11, %v1534_v45 }
0x1ff8   :  { %1547 = dma.vmem_to_hbm [thread:$0]  %s1543_s5, 32, %s1545_s18, [#allocation5]  }
0x1ff9   :  { %1751 = dma.done.wait [#allocation5], 32  }
0x1ffa   :  { %1752 = vsyncadd [#allocation5], 4294967264 }
0x1ffb   :  { %1552 = vsyncpa [#allocation5], 1 }

</bundles_post_ra>
